<compile_context>
chip_gen: v7x
topology: tpu7x:2x2x1
jax: 0.10.0
libtpu: 0.0.40
codegen_flags: <defaults>
</compile_context>

<pallas_src>
import functools

import jax
import jax.numpy as jnp
from jax import lax
from jax.experimental import pallas as pl
from jax.experimental.pallas import tpu as pltpu

EPS = 1e-6
LANE = 128
SUBLANE = 8


def _round_up(x, m):
    return (x + m - 1) // m * m


def _softplus(x):
    # numerically-stable softplus; exp/log go to the EUP slot
    return jnp.logaddexp(x, 0.0)


# ----------------------------- fused kernel ----------------------------------

def _vae_fused_kernel(x_ref, noise_ref,
                      w1e_ref, b1e_ref, wmve_ref, bmve_ref,
                      w1d_ref, b1d_ref, wmvd_ref, bmvd_ref,
                      xmean_ref, xvar_ref, zm_ref, zvk_ref,
                      *, latent, lp, dp):
    """One batch tile: encoder -> reparam -> decoder -> KLD, all in VMEM."""
    # ---- encoder (x already bf16 at the HBM boundary) ------------------------
    h = jnp.dot(x_ref[...], w1e_ref[...],
                preferred_element_type=jnp.float32) + b1e_ref[...]
    h = jnp.maximum(h, 0.0)                                          # (TB, HP) f32

    # packed encoder head: lanes [0, LP) = mean, [LP, 2*LP) = var pre-activation
    raw_z = jnp.dot(h.astype(jnp.bfloat16), wmve_ref[...],
                    preferred_element_type=jnp.float32) + bmve_ref[...]
    z_mean = raw_z[:, :lp]                     # padded lanes (>= latent) are 0
    z_var = _softplus(raw_z[:, lp:]) + EPS     # strictly positive, f32

    # ---- reparameterization ---------------------------------------------------
    z = noise_ref[...] * jnp.sqrt(z_var) + z_mean     # padded lanes hit zero W1d rows

    # ---- decoder ---------------------------------------------------------------
    hd = jnp.dot(z.astype(jnp.bfloat16), w1d_ref[...],
                 preferred_element_type=jnp.float32) + b1d_ref[...]
    hd = jnp.maximum(hd, 0.0)

    # packed decoder head: lanes [0, DP) = mean, [DP, 2*DP) = var pre-activation
    raw_x = jnp.dot(hd.astype(jnp.bfloat16), wmvd_ref[...],
                    preferred_element_type=jnp.float32) + bmvd_ref[...]
    xmean_ref[...] = raw_x[:, :dp].astype(xmean_ref.dtype)            # bf16 out
    xvar_ref[...] = (_softplus(raw_x[:, dp:]) + EPS).astype(xvar_ref.dtype)

    # ---- KLD(q(z|x) || N(0,1)) over the real latent lanes only ---------------
    lane = lax.broadcasted_iota(jnp.int32, z_mean.shape, 1)
    valid = lane < latent
    kld_terms = jnp.where(valid,
                          1.0 + jnp.log(z_var) - z_mean * z_mean - z_var, 0.0)
    kld = -0.5 * jnp.sum(kld_terms, axis=-1, keepdims=True)           # (TB, 1)

    # ---- lane-dense latent outputs (f32) --------------------------------------
    zm_ref[...] = z_mean
    # z_var in lanes [0, latent); KLD stashed in the (guaranteed) spare lane
    # `latent` (lp = round_up(latent + 1, 128) so this lane always exists).
    zvk_ref[...] = jnp.where(valid, z_var, jnp.where(lane == latent, kld, 0.0))


# ----------------------------- sizing helpers ----------------------------------

def _vmem_capacity_bytes():
    try:
        return int(pltpu.get_tpu_info().vmem_capacity_bytes)
    except Exception:
        return 64 << 20          # conservative default (v7x per-TC)


def _per_row_vmem_bytes(dp, hp, lp):
    """Per-batch-row VMEM cost: double-buffered pipeline tiles + in-kernel
    intermediates (h/hd, raw_x, raw_z, bf16 cast copies)."""
    io = 2 * (2 * dp             # x (bf16), double-buffered
              + 4 * lp           # noise (f32)
              + 2 * 2 * dp       # x_mean + x_var (bf16)
              + 2 * 4 * lp)      # z_mean + z_var/KLD slabs (f32)
    inter = (4 * 2 * hp          # h, hd (f32)
             + 4 * 2 * dp        # raw_x (f32) -- the big one on v7x
             + 4 * 8 * lp        # raw_z, z_mean, z_var, z, kld terms, misc
             + 2 * (2 * hp + lp))  # bf16 copies of h, hd, z
    return io + inter


def _choose_batch_tile(b, per_row_bytes, weight_bytes):
    """Pick (tile, need_pad). Prefers zero-copy tiles (tb divides b) and >= 2
    grid steps so ('parallel',) can shard across both v7x TensorCores."""
    vmem_cap = _vmem_capacity_bytes()
    # generation-aware budget: ~64 MiB on 128-MiB parts (v5e/v6e), ~32 MiB on v7x
    budget = max(16 << 20, min(64 << 20, vmem_cap // 2))
    budget -= 2 * weight_bytes + (2 << 20)       # resident (double-buffered) weights
    max_tb = max(SUBLANE, min(1024, budget // per_row_bytes) // SUBLANE * SUBLANE)

    # 1) zero-copy with >= 2 grid steps: largest multiple-of-8 divisor of b
    if b % SUBLANE == 0 and b >= 2 * SUBLANE:
        t = min(max_tb, (b // 2) // SUBLANE * SUBLANE)
        while t >= SUBLANE:
            if b % t == 0 and t >= min(256, b // 2):
                return t, False
            t -= SUBLANE
    # 2) zero-copy single full-batch block (legal for any b: block == array dim)
    if b <= max_tb:
        return b, False
    # 3) fallback: pad the batch, with minimal padding overhead
    nsteps = -(-b // max_tb)
    tb = min(max_tb, _round_up(-(-b // nsteps), SUBLANE))
    return tb, True


# ----------------------------- wrappers ---------------------------------------

def vae_fused_call(x2d, noise, packed, *, in_dim, latent, hp, lp, dp):
    b = x2d.shape[0]

    weight_args = (packed["w1e"], packed["b1e"], packed["wmve"], packed["bmve"],
                   packed["w1d"], packed["b1d"], packed["wmvd"], packed["bmvd"])
    weight_bytes = sum(int(w.size) * w.dtype.itemsize for w in weight_args)
    per_row = _per_row_vmem_bytes(dp, hp, lp)
    tb, need_pad = _choose_batch_tile(b, per_row, weight_bytes)

    # bf16 at the HBM boundary (no-op if the caller already provides bf16)
    x_in = x2d if x2d.dtype == jnp.bfloat16 else x2d.astype(jnp.bfloat16)
    if dp != in_dim:                               # rare: pad features to 128 lanes
        x_in = jnp.pad(x_in, ((0, 0), (0, dp - in_dim)))
    # noise slab: (B, latent) -> (B, lp); tiny vs the x read (and optional: could
    # be generated in-kernel with pltpu.prng_seed + pltpu.stateful_normal).
    n_in = noise.astype(jnp.float32)
    if lp != latent:
        n_in = jnp.pad(n_in, ((0, 0), (0, lp - latent)))

    if need_pad:                                   # rare fallback only
        bp = _round_up(b, tb)
        x_in = jnp.pad(x_in, ((0, bp - b), (0, 0)))
        n_in = jnp.pad(n_in, ((0, bp - b), (0, 0)))
    else:
        bp = b

    def row_spec(cols):
        return pl.BlockSpec((tb, cols), lambda i: (i, 0))

    def full_spec(shape):
        # resident weights (constant block index). NOTE: single-buffering them
        # (pipeline_mode=pl.Buffered(1)) would halve their VMEM; we instead
        # account for the default double buffer in the tile-size budget.
        return pl.BlockSpec(shape, lambda i: (0, 0))

    weight_specs = [full_spec(w.shape) for w in weight_args]

    # VMEM budget: activation tiles + intermediates + double-buffered weights.
    act_bytes = tb * per_row
    vmem_cap = _vmem_capacity_bytes()
    vmem_limit = int(min(max(act_bytes + 2 * weight_bytes + (4 << 20), 16 << 20),
                         min(vmem_cap * 7 // 8, 100 << 20)))

    kernel = functools.partial(_vae_fused_kernel, latent=latent, lp=lp, dp=dp)

    xm, xv, zm, zvk = pl.pallas_call(
        kernel,
        grid=(bp // tb,),
        in_specs=[row_spec(dp), row_spec(lp)] + weight_specs,
        out_specs=(row_spec(dp), row_spec(dp), row_spec(lp), row_spec(lp)),
        out_shape=(jax.ShapeDtypeStruct((bp, dp), jnp.bfloat16),
                   jax.ShapeDtypeStruct((bp, dp), jnp.bfloat16),
                   jax.ShapeDtypeStruct((bp, lp), jnp.float32),
                   jax.ShapeDtypeStruct((bp, lp), jnp.float32)),
        compiler_params=pltpu.CompilerParams(
            dimension_semantics=("parallel",),
            vmem_limit_bytes=vmem_limit),
    )(x_in, n_in, *weight_args)

    if need_pad:
        xm, xv, zm, zvk = xm[:b], xv[:b], zm[:b], zvk[:b]
    if dp != in_dim:
        xm, xv = xm[:, :in_dim], xv[:, :in_dim]

    z_mean = zm[:, :latent]
    z_var = zvk[:, :latent]
    kld = zvk[:, latent]
    return xm, xv, z_mean, z_var, kld


def vae_forward(x_nchw, noise, packed, dims, with_regularization=False):
    """Mirrors VAE.forward; additionally returns the fused KLD (regularizer).
    x_mean/x_var are emitted in bf16 (HBM-boundary precision choice)."""
    B, C, H, W = x_nchw.shape
    d = C * H * W
    x2d = x_nchw.reshape(B, d)                     # glue: flatten NCHW
    x_mean, x_var, z_mean, z_var, kld = vae_fused_call(
        x2d, noise, packed, in_dim=d, latent=dims["latent"],
        hp=dims["hp"], lp=dims["lp"], dp=dims["dp"])
    x_mean = x_mean.reshape(B, C, H, W)
    x_var = x_var.reshape(B, C, H, W)
    if with_regularization:
        return (x_mean, x_var, (z_mean, z_var)), kld
    return (x_mean, x_var), kld


# ----------------------------- params -----------------------------------------

def init_params(key, in_dim, hidden, latent):
    ks = jax.random.split(key, 6)

    def lin(k, fan_in, fan_out):
        scale = 1.0 / jnp.sqrt(fan_in)
        return jax.random.uniform(k, (fan_in, fan_out), jnp.float32, -scale, scale)

    return {
        # encoder
        "w1e": lin(ks[0], in_dim, hidden), "b1e": jnp.zeros((1, hidden), jnp.float32),
        "wme": lin(ks[1], hidden, latent), "bme": jnp.zeros((1, latent), jnp.float32),
        "wve": lin(ks[2], hidden, latent), "bve": jnp.zeros((1, latent), jnp.float32),
        # decoder
        "w1d": lin(ks[3], latent, hidden), "b1d": jnp.zeros((1, hidden), jnp.float32),
        "wmd": lin(ks[4], hidden, in_dim), "bmd": jnp.zeros((1, in_dim), jnp.float32),
        "wvd": lin(ks[5], hidden, in_dim), "bvd": jnp.zeros((1, in_dim), jnp.float32),
    }


def pack_params(raw, in_dim, hidden, latent):
    """Zero-pad hidden/latent/features to 128 lanes and pack mean/var pairs.
    lp reserves one spare lane beyond `latent` for the KLD stash."""
    hp = _round_up(hidden, LANE)
    lp = _round_up(latent + 1, LANE)       # always a spare lane for KLD
    dp = _round_up(in_dim, LANE)

    def pad2(a, rows, cols):
        return jnp.pad(a, ((0, rows - a.shape[0]), (0, cols - a.shape[1])))

    packed = {
        "w1e": pad2(raw["w1e"], dp, hp).astype(jnp.bfloat16),
        "b1e": pad2(raw["b1e"], 1, hp),
        "wmve": jnp.concatenate(
            [pad2(raw["wme"], hp, lp), pad2(raw["wve"], hp, lp)],
            axis=1).astype(jnp.bfloat16),
        "bmve": jnp.concatenate(
            [pad2(raw["bme"], 1, lp), pad2(raw["bve"], 1, lp)], axis=1),
        "w1d": pad2(raw["w1d"], lp, hp).astype(jnp.bfloat16),
        "b1d": pad2(raw["b1d"], 1, hp),
        "wmvd": jnp.concatenate(
            [pad2(raw["wmd"], hp, dp), pad2(raw["wvd"], hp, dp)],
            axis=1).astype(jnp.bfloat16),
        "bmvd": jnp.concatenate(
            [pad2(raw["bmd"], 1, dp), pad2(raw["bvd"], 1, dp)], axis=1),
    }
    dims = {"latent": latent, "hp": hp, "lp": lp, "dp": dp}
    return packed, dims


# ----------------------------- reference (pure JAX) ---------------------------

def ref_forward(x2d, noise, raw):
    """Same math, emulating the kernel's bf16-in / f32-accumulate matmuls."""
    def mm(a, w):
        return jnp.dot(a.astype(jnp.bfloat16), w.astype(jnp.bfloat16),
                       preferred_element_type=jnp.float32)
    h = jnp.maximum(mm(x2d, raw["w1e"]) + raw["b1e"], 0.0)
    z_mean = mm(h, raw["wme"]) + raw["bme"]
    z_var = jnp.logaddexp(mm(h, raw["wve"]) + raw["bve"], 0.0) + EPS
    z = noise * jnp.sqrt(z_var) + z_mean
    hd = jnp.maximum(mm(z, raw["w1d"]) + raw["b1d"], 0.0)
    x_mean = mm(hd, raw["wmd"]) + raw["bmd"]
    x_var = jnp.logaddexp(mm(hd, raw["wvd"]) + raw["bvd"], 0.0) + EPS
    kld = -0.5 * jnp.sum(1.0 + jnp.log(z_var) - z_mean ** 2 - z_var, axis=-1)
    return x_mean, x_var, z_mean, z_var, kld


# ----------------------------- demo --------------------------------------------

if __name__ == "__main__":
    B, C, H, W = 2, 4, 16, 16
    hidden = 32
    latent = 8
    D = C * H * W

    key = jax.random.PRNGKey(0)
    k_x, k_noise, k_params = jax.random.split(key, 3)

    x = jax.random.normal(k_x, (B, C, H, W), jnp.float32)
    noise = jax.random.normal(k_noise, (B, latent), jnp.float32)   # randn_like(z_mean)
    raw = init_params(k_params, D, hidden, latent)
    packed, dims = pack_params(raw, D, hidden, latent)

    (x_mean, x_var, (z_mean, z_var)), kld = vae_forward(
        x, noise, packed, dims, with_regularization=True)
    jax.block_until_ready((x_mean, x_var, z_mean, z_var, kld))

    # shape / dtype / positivity sanity
    assert x_mean.shape == (B, C, H, W) and x_var.shape == (B, C, H, W)
    assert z_mean.shape == (B, latent) and z_var.shape == (B, latent)
    assert kld.shape == (B,)
    assert bool(jnp.all(x_var.astype(jnp.float32) > 0)) and bool(jnp.all(z_var > 0))

    # pure-JAX reference check (same bf16 matmul emulation; outputs are bf16 so
    # tolerance covers the final bf16 rounding of x_mean / x_var)
    rxm, rxv, rzm, rzv, rkld = ref_forward(x.reshape(B, D), noise, raw)
    xm32 = x_mean.astype(jnp.float32).reshape(B, D)
    xv32 = x_var.astype(jnp.float32).reshape(B, D)
    assert jnp.allclose(xm32, rxm, rtol=2e-2, atol=2e-2)
    assert jnp.allclose(xv32, rxv, rtol=2e-2, atol=2e-2)
    assert jnp.allclose(z_mean, rzm, rtol=1e-2, atol=1e-2)
    assert jnp.allclose(z_var, rzv, rtol=1e-2, atol=1e-2)
    assert jnp.allclose(kld, rkld, rtol=1e-2, atol=1e-2)

    print("KERNEL_OK")
</pallas_src>

<mosaic_0001>
module attributes {stable_mosaic.version = 11 : i64} {
  func.func @_vae_fused_kernel(%arg0: i32, %arg1: memref<2x1024xbf16, #tpu.memory_space<vmem>>, %arg2: memref<2x128xf32, #tpu.memory_space<vmem>>, %arg3: memref<1024x128xbf16, #tpu.memory_space<vmem>>, %arg4: memref<1x128xf32, #tpu.memory_space<vmem>>, %arg5: memref<128x256xbf16, #tpu.memory_space<vmem>>, %arg6: memref<1x256xf32, #tpu.memory_space<vmem>>, %arg7: memref<128x128xbf16, #tpu.memory_space<vmem>>, %arg8: memref<1x128xf32, #tpu.memory_space<vmem>>, %arg9: memref<128x2048xbf16, #tpu.memory_space<vmem>>, %arg10: memref<1x2048xf32, #tpu.memory_space<vmem>>, %arg11: memref<2x1024xbf16, #tpu.memory_space<vmem>>, %arg12: memref<2x1024xbf16, #tpu.memory_space<vmem>>, %arg13: memref<2x128xf32, #tpu.memory_space<vmem>>, %arg14: memref<2x128xf32, #tpu.memory_space<vmem>>) attributes {dimension_semantics = [#tpu.dimension_semantics<parallel>], iteration_bounds = array<i64: 1>, scalar_prefetch = 0 : i64, scratch_operands = 0 : i64, tpu.core_type = #tpu.core_type<tc>, window_params = [{transform_indices = @transform_0, window_bounds = array<i64: 2, 1024>}, {transform_indices = @transform_1, window_bounds = array<i64: 2, 128>}, {pipeline_mode = #tpu.pipeline_mode<synchronous>, transform_indices = @transform_2, window_bounds = array<i64: 1024, 128>}, {pipeline_mode = #tpu.pipeline_mode<synchronous>, transform_indices = @transform_3, window_bounds = array<i64: 1, 128>}, {pipeline_mode = #tpu.pipeline_mode<synchronous>, transform_indices = @transform_4, window_bounds = array<i64: 128, 256>}, {pipeline_mode = #tpu.pipeline_mode<synchronous>, transform_indices = @transform_5, window_bounds = array<i64: 1, 256>}, {pipeline_mode = #tpu.pipeline_mode<synchronous>, transform_indices = @transform_6, window_bounds = array<i64: 128, 128>}, {pipeline_mode = #tpu.pipeline_mode<synchronous>, transform_indices = @transform_7, window_bounds = array<i64: 1, 128>}, {pipeline_mode = #tpu.pipeline_mode<synchronous>, transform_indices = @transform_8, window_bounds = array<i64: 128, 2048>}, {pipeline_mode = #tpu.pipeline_mode<synchronous>, transform_indices = @transform_9, window_bounds = array<i64: 1, 2048>}, {transform_indices = @transform_10, window_bounds = array<i64: 2, 1024>}, {transform_indices = @transform_11, window_bounds = array<i64: 2, 1024>}, {transform_indices = @transform_12, window_bounds = array<i64: 2, 128>}, {transform_indices = @transform_13, window_bounds = array<i64: 2, 128>}]} {
    %c0 = arith.constant 0 : index
    %c0_0 = arith.constant 0 : index
    %0 = vector.load %arg1[%c0, %c0_0] : memref<2x1024xbf16, #tpu.memory_space<vmem>>, vector<2x1024xbf16>
    %c0_1 = arith.constant 0 : index
    %c0_2 = arith.constant 0 : index
    %1 = vector.load %arg3[%c0_1, %c0_2] : memref<1024x128xbf16, #tpu.memory_space<vmem>>, vector<1024x128xbf16>
    %cst = arith.constant dense<0.000000e+00> : vector<2x128xf32>
    %2 = tpu.matmul %0, %1, %cst {dimension_numbers = #tpu.dot_dimension_numbers<[1], [0], [0], [1], [0, 0, 1, 1], [], []>} : vector<2x1024xbf16>, vector<1024x128xbf16>, vector<2x128xf32> -> vector<2x128xf32>
    %c0_3 = arith.constant 0 : index
    %c0_4 = arith.constant 0 : index
    %3 = vector.load %arg4[%c0_3, %c0_4] : memref<1x128xf32, #tpu.memory_space<vmem>>, vector<1x128xf32>
    %4 = vector.broadcast %3 : vector<1x128xf32> to vector<2x128xf32>
    %5 = arith.addf %2, %4 : vector<2x128xf32>
    %cst_5 = arith.constant 0.000000e+00 : f32
    %6 = vector.broadcast %cst_5 : f32 to vector<2x128xf32>
    %7 = arith.maximumf %5, %6 : vector<2x128xf32>
    %8 = arith.truncf %7 : vector<2x128xf32> to vector<2x128xbf16>
    %c0_6 = arith.constant 0 : index
    %c0_7 = arith.constant 0 : index
    %9 = vector.load %arg5[%c0_6, %c0_7] : memref<128x256xbf16, #tpu.memory_space<vmem>>, vector<128x256xbf16>
    %cst_8 = arith.constant dense<0.000000e+00> : vector<2x256xf32>
    %10 = tpu.matmul %8, %9, %cst_8 {dimension_numbers = #tpu.dot_dimension_numbers<[1], [0], [0], [1], [0, 0, 1, 1], [], []>} : vector<2x128xbf16>, vector<128x256xbf16>, vector<2x256xf32> -> vector<2x256xf32>
    %c0_9 = arith.constant 0 : index
    %c0_10 = arith.constant 0 : index
    %11 = vector.load %arg6[%c0_9, %c0_10] : memref<1x256xf32, #tpu.memory_space<vmem>>, vector<1x256xf32>
    %12 = vector.broadcast %11 : vector<1x256xf32> to vector<2x256xf32>
    %13 = arith.addf %10, %12 : vector<2x256xf32>
    %14 = vector.extract_strided_slice %13 {offsets = [0, 0], sizes = [2, 128], strides = [1, 1]} : vector<2x256xf32> to vector<2x128xf32>
    %15 = vector.extract_strided_slice %13 {offsets = [0, 128], sizes = [2, 128], strides = [1, 1]} : vector<2x256xf32> to vector<2x128xf32>
    %cst_11 = arith.constant 0.000000e+00 : f32
    %16 = vector.broadcast %cst_11 : f32 to vector<2x128xf32>
    %17 = arith.maximumf %15, %16 : vector<2x128xf32>
    %18 = vector.broadcast %cst_11 : f32 to vector<2x128xf32>
    %19 = arith.subf %15, %18 : vector<2x128xf32>
    %20 = arith.cmpf one, %19, %19 : vector<2x128xf32>
    %21 = vector.broadcast %cst_11 : f32 to vector<2x128xf32>
    %22 = arith.addf %15, %21 : vector<2x128xf32>
    %23 = math.absf %19 : vector<2x128xf32>
    %cst_12 = arith.constant 0.000000e+00 : f32
    %24 = vector.broadcast %cst_12 : f32 to vector<2x128xf32>
    %25 = arith.subf %24, %23 : vector<2x128xf32>
    %26 = math.exp %25 : vector<2x128xf32>
    %27 = math.log1p %26 : vector<2x128xf32>
    %28 = arith.addf %17, %27 : vector<2x128xf32>
    %29 = arith.select %20, %22, %28 : vector<2x128xi1>, vector<2x128xf32>
    %cst_13 = arith.constant 9.99999997E-7 : f32
    %30 = vector.broadcast %cst_13 : f32 to vector<2x128xf32>
    %31 = arith.addf %29, %30 : vector<2x128xf32>
    %c0_14 = arith.constant 0 : index
    %c0_15 = arith.constant 0 : index
    %32 = vector.load %arg2[%c0_14, %c0_15] : memref<2x128xf32, #tpu.memory_space<vmem>>, vector<2x128xf32>
    %33 = math.sqrt %31 : vector<2x128xf32>
    %34 = arith.mulf %32, %33 : vector<2x128xf32>
    %35 = arith.addf %34, %14 : vector<2x128xf32>
    %36 = arith.truncf %35 : vector<2x128xf32> to vector<2x128xbf16>
    %c0_16 = arith.constant 0 : index
    %c0_17 = arith.constant 0 : index
    %37 = vector.load %arg7[%c0_16, %c0_17] : memref<128x128xbf16, #tpu.memory_space<vmem>>, vector<128x128xbf16>
    %cst_18 = arith.constant dense<0.000000e+00> : vector<2x128xf32>
    %38 = tpu.matmul %36, %37, %cst_18 {dimension_numbers = #tpu.dot_dimension_numbers<[1], [0], [0], [1], [0, 0, 1, 1], [], []>} : vector<2x128xbf16>, vector<128x128xbf16>, vector<2x128xf32> -> vector<2x128xf32>
    %c0_19 = arith.constant 0 : index
    %c0_20 = arith.constant 0 : index
    %39 = vector.load %arg8[%c0_19, %c0_20] : memref<1x128xf32, #tpu.memory_space<vmem>>, vector<1x128xf32>
    %40 = vector.broadcast %39 : vector<1x128xf32> to vector<2x128xf32>
    %41 = arith.addf %38, %40 : vector<2x128xf32>
    %cst_21 = arith.constant 0.000000e+00 : f32
    %42 = vector.broadcast %cst_21 : f32 to vector<2x128xf32>
    %43 = arith.maximumf %41, %42 : vector<2x128xf32>
    %44 = arith.truncf %43 : vector<2x128xf32> to vector<2x128xbf16>
    %c0_22 = arith.constant 0 : index
    %c0_23 = arith.constant 0 : index
    %45 = vector.load %arg9[%c0_22, %c0_23] : memref<128x2048xbf16, #tpu.memory_space<vmem>>, vector<128x2048xbf16>
    %cst_24 = arith.constant dense<0.000000e+00> : vector<2x2048xf32>
    %46 = tpu.matmul %44, %45, %cst_24 {dimension_numbers = #tpu.dot_dimension_numbers<[1], [0], [0], [1], [0, 0, 1, 1], [], []>} : vector<2x128xbf16>, vector<128x2048xbf16>, vector<2x2048xf32> -> vector<2x2048xf32>
    %c0_25 = arith.constant 0 : index
    %c0_26 = arith.constant 0 : index
    %47 = vector.load %arg10[%c0_25, %c0_26] : memref<1x2048xf32, #tpu.memory_space<vmem>>, vector<1x2048xf32>
    %48 = vector.broadcast %47 : vector<1x2048xf32> to vector<2x2048xf32>
    %49 = arith.addf %46, %48 : vector<2x2048xf32>
    %50 = vector.extract_strided_slice %49 {offsets = [0, 0], sizes = [2, 1024], strides = [1, 1]} : vector<2x2048xf32> to vector<2x1024xf32>
    %51 = arith.truncf %50 : vector<2x1024xf32> to vector<2x1024xbf16>
    %c0_27 = arith.constant 0 : index
    %c0_28 = arith.constant 0 : index
    %52 = vector.load %arg11[%c0_27, %c0_28] : memref<2x1024xbf16, #tpu.memory_space<vmem>>, vector<2x1024xbf16>
    tpu.vector_store %arg11[%c0_27, %c0_28], %51 {strides = array<i32>} : memref<2x1024xbf16, #tpu.memory_space<vmem>>, vector<2x1024xbf16>,
    %53 = vector.extract_strided_slice %49 {offsets = [0, 1024], sizes = [2, 1024], strides = [1, 1]} : vector<2x2048xf32> to vector<2x1024xf32>
    %cst_29 = arith.constant 0.000000e+00 : f32
    %54 = vector.broadcast %cst_29 : f32 to vector<2x1024xf32>
    %55 = arith.maximumf %53, %54 : vector<2x1024xf32>
    %56 = vector.broadcast %cst_29 : f32 to vector<2x1024xf32>
    %57 = arith.subf %53, %56 : vector<2x1024xf32>
    %58 = arith.cmpf one, %57, %57 : vector<2x1024xf32>
    %59 = vector.broadcast %cst_29 : f32 to vector<2x1024xf32>
    %60 = arith.addf %53, %59 : vector<2x1024xf32>
    %61 = math.absf %57 : vector<2x1024xf32>
    %cst_30 = arith.constant 0.000000e+00 : f32
    %62 = vector.broadcast %cst_30 : f32 to vector<2x1024xf32>
    %63 = arith.subf %62, %61 : vector<2x1024xf32>
    %64 = math.exp %63 : vector<2x1024xf32>
    %65 = math.log1p %64 : vector<2x1024xf32>
    %66 = arith.addf %55, %65 : vector<2x1024xf32>
    %67 = arith.select %58, %60, %66 : vector<2x1024xi1>, vector<2x1024xf32>
    %cst_31 = arith.constant 9.99999997E-7 : f32
    %68 = vector.broadcast %cst_31 : f32 to vector<2x1024xf32>
    %69 = arith.addf %67, %68 : vector<2x1024xf32>
    %70 = arith.truncf %69 : vector<2x1024xf32> to vector<2x1024xbf16>
    %c0_32 = arith.constant 0 : index
    %c0_33 = arith.constant 0 : index
    %71 = vector.load %arg12[%c0_32, %c0_33] : memref<2x1024xbf16, #tpu.memory_space<vmem>>, vector<2x1024xbf16>
    tpu.vector_store %arg12[%c0_32, %c0_33], %70 {strides = array<i32>} : memref<2x1024xbf16, #tpu.memory_space<vmem>>, vector<2x1024xbf16>,
    %72 = tpu.iota {dimensions = array<i32: 1>} : vector<2x128xi32>
    %c8_i32 = arith.constant 8 : i32
    %73 = vector.broadcast %c8_i32 : i32 to vector<2x128xi32>
    %74 = arith.cmpi slt, %72, %73 : vector<2x128xi32>
    %75 = math.log %31 : vector<2x128xf32>
    %cst_34 = arith.constant 1.000000e+00 : f32
    %76 = vector.broadcast %cst_34 : f32 to vector<2x128xf32>
    %77 = arith.addf %76, %75 : vector<2x128xf32>
    %78 = arith.mulf %14, %14 : vector<2x128xf32>
    %79 = arith.subf %77, %78 : vector<2x128xf32>
    %80 = arith.subf %79, %31 : vector<2x128xf32>
    %cst_35 = arith.constant 0.000000e+00 : f32
    %81 = vector.broadcast %cst_35 : f32 to vector<2x128xf32>
    %82 = arith.select %74, %80, %81 : vector<2x128xi1>, vector<2x128xf32>
    %cst_36 = arith.constant dense<0.000000e+00> : vector<2xf32>
    %83 = vector.multi_reduction <add>, %82, %cst_36 [1] : vector<2x128xf32> to vector<2xf32>
    %84 = vector.shape_cast %83 : vector<2xf32> to vector<2x1xf32>
    %cst_37 = arith.constant -5.000000e-01 : f32
    %85 = vector.broadcast %cst_37 : f32 to vector<2x1xf32>
    %86 = arith.mulf %85, %84 : vector<2x1xf32>
    %c0_38 = arith.constant 0 : index
    %c0_39 = arith.constant 0 : index
    %87 = vector.load %arg13[%c0_38, %c0_39] : memref<2x128xf32, #tpu.memory_space<vmem>>, vector<2x128xf32>
    tpu.vector_store %arg13[%c0_38, %c0_39], %14 {strides = array<i32>} : memref<2x128xf32, #tpu.memory_space<vmem>>, vector<2x128xf32>,
    %c8_i32_40 = arith.constant 8 : i32
    %88 = vector.broadcast %c8_i32_40 : i32 to vector<2x128xi32>
    %89 = arith.cmpi eq, %72, %88 : vector<2x128xi32>
    %cst_41 = arith.constant 0.000000e+00 : f32
    %90 = vector.shape_cast %86 : vector<2x1xf32> to vector<2x1xf32>
    %91 = vector.broadcast %90 : vector<2x1xf32> to vector<2x128xf32>
    %92 = vector.broadcast %cst_41 : f32 to vector<2x128xf32>
    %93 = arith.select %89, %91, %92 : vector<2x128xi1>, vector<2x128xf32>
    %94 = arith.select %74, %31, %93 : vector<2x128xi1>, vector<2x128xf32>
    %c0_42 = arith.constant 0 : index
    %c0_43 = arith.constant 0 : index
    %95 = vector.load %arg14[%c0_42, %c0_43] : memref<2x128xf32, #tpu.memory_space<vmem>>, vector<2x128xf32>
    tpu.vector_store %arg14[%c0_42, %c0_43], %94 {strides = array<i32>} : memref<2x128xf32, #tpu.memory_space<vmem>>, vector<2x128xf32>,
    return
  }
  func.func @transform_0(%arg0: i32) -> (i32, i32) {
    %c0_i32 = arith.constant 0 : i32
    %c0_i32_0 = arith.constant 0 : i32
    return %arg0, %c0_i32 : i32, i32
  }
  func.func @transform_1(%arg0: i32) -> (i32, i32) {
    %c0_i32 = arith.constant 0 : i32
    %c0_i32_0 = arith.constant 0 : i32
    return %arg0, %c0_i32 : i32, i32
  }
  func.func @transform_2(%arg0: i32) -> (i32, i32) {
    %c0_i32 = arith.constant 0 : i32
    %c0_i32_0 = arith.constant 0 : i32
    %c0_i32_1 = arith.constant 0 : i32
    return %c0_i32, %c0_i32_0 : i32, i32
  }
  func.func @transform_3(%arg0: i32) -> (i32, i32) {
    %c0_i32 = arith.constant 0 : i32
    %c0_i32_0 = arith.constant 0 : i32
    %c0_i32_1 = arith.constant 0 : i32
    return %c0_i32, %c0_i32_0 : i32, i32
  }
  func.func @transform_4(%arg0: i32) -> (i32, i32) {
    %c0_i32 = arith.constant 0 : i32
    %c0_i32_0 = arith.constant 0 : i32
    %c0_i32_1 = arith.constant 0 : i32
    return %c0_i32, %c0_i32_0 : i32, i32
  }
  func.func @transform_5(%arg0: i32) -> (i32, i32) {
    %c0_i32 = arith.constant 0 : i32
    %c0_i32_0 = arith.constant 0 : i32
    %c0_i32_1 = arith.constant 0 : i32
    return %c0_i32, %c0_i32_0 : i32, i32
  }
  func.func @transform_6(%arg0: i32) -> (i32, i32) {
    %c0_i32 = arith.constant 0 : i32
    %c0_i32_0 = arith.constant 0 : i32
    %c0_i32_1 = arith.constant 0 : i32
    return %c0_i32, %c0_i32_0 : i32, i32
  }
  func.func @transform_7(%arg0: i32) -> (i32, i32) {
    %c0_i32 = arith.constant 0 : i32
    %c0_i32_0 = arith.constant 0 : i32
    %c0_i32_1 = arith.constant 0 : i32
    return %c0_i32, %c0_i32_0 : i32, i32
  }
  func.func @transform_8(%arg0: i32) -> (i32, i32) {
    %c0_i32 = arith.constant 0 : i32
    %c0_i32_0 = arith.constant 0 : i32
    %c0_i32_1 = arith.constant 0 : i32
    return %c0_i32, %c0_i32_0 : i32, i32
  }
  func.func @transform_9(%arg0: i32) -> (i32, i32) {
    %c0_i32 = arith.constant 0 : i32
    %c0_i32_0 = arith.constant 0 : i32
    %c0_i32_1 = arith.constant 0 : i32
    return %c0_i32, %c0_i32_0 : i32, i32
  }
  func.func @transform_10(%arg0: i32) -> (i32, i32) {
    %c0_i32 = arith.constant 0 : i32
    %c0_i32_0 = arith.constant 0 : i32
    return %arg0, %c0_i32 : i32, i32
  }
  func.func @transform_11(%arg0: i32) -> (i32, i32) {
    %c0_i32 = arith.constant 0 : i32
    %c0_i32_0 = arith.constant 0 : i32
    return %arg0, %c0_i32 : i32, i32
  }
  func.func @transform_12(%arg0: i32) -> (i32, i32) {
    %c0_i32 = arith.constant 0 : i32
    %c0_i32_0 = arith.constant 0 : i32
    return %arg0, %c0_i32 : i32, i32
  }
  func.func @transform_13(%arg0: i32) -> (i32, i32) {
    %c0_i32 = arith.constant 0 : i32
    %c0_i32_0 = arith.constant 0 : i32
    return %arg0, %c0_i32 : i32, i32
  }
}

</mosaic_0001>

<bundles_post_ra>
// kernel: tpu_custom_call.1
= control target key start
LH: loop header
LB: loop body
LE: loop exit
PB: predicated region body
PF: predicated region fallthrough
CT: control target
= control target key end

     0   :  { %19 = vsyncpa [#allocation3], 0  ;;  %s3820_s0 = inlined_call_operand.hbm [shape: bf16[2,1024], index: 0, kind: input, shape index: {}]   ;;  %s3821_s1 = inlined_call_operand.vmem [shape: f32[2,128], index: 1, kind: input, shape index: {}]   ;;  %s3822_s2 = inlined_call_operand.hbm [shape: bf16[1024,128], index: 2, kind: input, shape index: {}]   ;;  %s3823_s3 = inlined_call_operand.vmem [shape: f32[1,128], index: 3, kind: input, shape index: {}]   ;;  %s3824_s4 = inlined_call_operand.hbm [shape: bf16[128,256], index: 4, kind: input, shape index: {}]   ;;  %s3825_s5 = inlined_call_operand.vmem [shape: f32[1,256], index: 5, kind: input, shape index: {}]   ;;  %s3826_s6 = inlined_call_operand.hbm [shape: bf16[128,128], index: 6, kind: input, shape index: {}]   ;;  %s3827_s7 = inlined_call_operand.vmem [shape: f32[1,128], index: 7, kind: input, shape index: {}]   ;;  %s3828_s8 = inlined_call_operand.hbm [shape: bf16[128,2048], index: 8, kind: input, shape index: {}]   ;;  %s3829_s9 = inlined_call_operand.vmem [shape: f32[1,2048], index: 9, kind: input, shape index: {}]   ;;  %s3830_s10 = inlined_call_operand.hbm [shape: bf16[2,1024], index: 10, kind: output, shape index: {0}]   ;;  %s3831_s11 = inlined_call_operand.hbm [shape: bf16[2,1024], index: 11, kind: output, shape index: {1}]   ;;  %s3832_s12 = inlined_call_operand.hbm [shape: f32[2,128], index: 12, kind: output, shape index: {2}]   ;;  %s3833_s13 = inlined_call_operand.hbm [shape: f32[2,128], index: 13, kind: output, shape index: {3}]  }
   0x1   :  { %20 = vsyncpa [#allocation6], 0 }
   0x2   :  { %21 = vsyncpa [#allocation9], 0 }
   0x3   :  { %22 = vsyncpa [#allocation4], 0 }
   0x4   :  { %23 = vsyncpa [#allocation13], 0 }
   0x5   :  { %24 = vsyncpa [#allocation16], 0  ;;  %s3393_s25 = smov [#allocation5]   ;;  %s3183_s29 = scalar_lea.hbm %s3822_s2, 8192 }
   0x6   :  { %s42_s26 = sshll.u32 %s3393_s25, 4  ;;  %p3184_p0 = scmp.ne.s32.totalorder %s3822_s2, %s3183_s29  ;;  %s43_s26 = int_to_ptr.vmem [resolvable:$true] %s42_s26 }
   0x7   :  { %p3187_p1 = scmp.lt.u32.totalorder %s3183_s29, %s3822_s2 }
   0x9   :  { %p3189_p2 = pnand %p3187_p1, %p3184_p0 }
   0xb   :  { %3192 = shalt.err (!%p3189_p2)
}
   0xc   :  { %s3193_s17 = scalar_lea.vmem %s43_s26, 8192  ;;  %p3198_p4 = scmp.lt.s32.totalorder %s43_s26, %s43_s26 }
   0xd   :  { %p3194_p3 = scmp.ne.s32.totalorder %s43_s26, %s3193_s17  ;;  %p3199_p5 = scmp.lt.s32.totalorder %s3193_s17, %s3193_s17 }
   0xf   :  { %p3200_p6 = por %p3199_p5, %p3198_p4 }
  0x11   :  { %p3201_p7 = pnand %p3200_p6, %p3194_p3 }
  0x13   :  { %3204 = shalt.err (!%p3201_p7)
}
  0x14   :  { %s3394_s18 = smov 64   ;;  %s3395_s19 = smov 4  }
  0x15   :  { %48 = dma.hbm_to_vmem [thread:$0]  %s3822_s2, 8192, %s43_s26, [#allocation6], %s3394_s18, %s3394_s18, %s3395_s19  }
  0x16   :  { %s3396_s22 = smov [#allocation8]   ;;  %s3397_s24 = smov [#allocation2]  }
  0x17   :  { %s70_s23 = sshll.u32 %s3396_s22, 4  ;;  %s31_s25 = sshll.u32 %s3397_s24, 4  ;;  %s71_s23 = int_to_ptr.vmem [resolvable:$true] %s70_s23  ;;  %s32_s25 = int_to_ptr.vmem [resolvable:$true] %s31_s25 }
  0x18   :  { %s3205_s29 = scalar_lea.hbm %s3826_s6, 1024 }
  0x19   :  { %p3206_p8 = scmp.ne.s32.totalorder %s3826_s6, %s3205_s29  ;;  %p3209_p9 = scmp.lt.u32.totalorder %s3205_s29, %s3826_s6 }
  0x1b   :  { %p3211_p10 = pnand %p3209_p9, %p3206_p8 }
  0x1d   :  { %3214 = shalt.err (!%p3211_p10)
}
  0x1e   :  { %s3215_s2 = scalar_lea.vmem %s71_s23, 1024  ;;  %p3220_p12 = scmp.lt.s32.totalorder %s71_s23, %s71_s23 }
  0x1f   :  { %p3216_p11 = scmp.ne.s32.totalorder %s71_s23, %s3215_s2  ;;  %p3221_p13 = scmp.lt.s32.totalorder %s3215_s2, %s3215_s2 }
  0x21   :  { %p3222_p0 = por %p3221_p13, %p3220_p12 }
  0x23   :  { %p3223_p1 = pnand %p3222_p0, %p3216_p11 }
  0x25   :  { %3226 = shalt.err (!%p3223_p1)
}
  0x26   :  { %76 = dma.hbm_to_vmem [thread:$0]  %s3826_s6, 1024, %s71_s23, [#allocation9], %s3394_s18, %s3394_s18, %s3395_s19  }
  0x27   :  { %s3227_s22 = scalar_lea.hbm %s3820_s0, 128 }
  0x28   :  { %p3228_p2 = scmp.ne.s32.totalorder %s3820_s0, %s3227_s22  ;;  %p3231_p3 = scmp.lt.u32.totalorder %s3227_s22, %s3820_s0 }
  0x2a   :  { %p3233_p4 = pnand %p3231_p3, %p3228_p2 }
  0x2c   :  { %3236 = shalt.err (!%p3233_p4)
}
  0x2d   :  { %s3237_s30 = scalar_lea.vmem %s32_s25, 128  ;;  %p3242_p6 = scmp.lt.s32.totalorder %s32_s25, %s32_s25 }
  0x2e   :  { %p3238_p5 = scmp.ne.s32.totalorder %s32_s25, %s3237_s30  ;;  %p3243_p7 = scmp.lt.s32.totalorder %s3237_s30, %s3237_s30 }
  0x30   :  { %p3244_p8 = por %p3243_p7, %p3242_p6 }
  0x32   :  { %p3245_p9 = pnand %p3244_p8, %p3238_p5 }
  0x34   :  { %3248 = shalt.err (!%p3245_p9)
}
  0x35   :  { %34 = dma.hbm_to_vmem [thread:$0]  %s3820_s0, 128, %s32_s25, [#allocation3]  }
  0x36   :  { %s3398_s23 = smov [#allocation7]   ;;  %s3249_s2 = scalar_lea.hbm %s3824_s4, 2048 }
  0x37   :  { %s56_s14 = sshll.u32 %s3398_s23, 4  ;;  %p3250_p10 = scmp.ne.s32.totalorder %s3824_s4, %s3249_s2  ;;  %s57_s14 = int_to_ptr.vmem [resolvable:$true] %s56_s14 }
  0x38   :  { %p3253_p11 = scmp.lt.u32.totalorder %s3249_s2, %s3824_s4 }
  0x3a   :  { %p3255_p12 = pnand %p3253_p11, %p3250_p10 }
  0x3c   :  { %3258 = shalt.err (!%p3255_p12)
}
  0x3d   :  { %s3259_s22 = scalar_lea.vmem %s57_s14, 2048  ;;  %p3264_p0 = scmp.lt.s32.totalorder %s57_s14, %s57_s14 }
  0x3e   :  { %p3260_p13 = scmp.ne.s32.totalorder %s57_s14, %s3259_s22  ;;  %p3265_p1 = scmp.lt.s32.totalorder %s3259_s22, %s3259_s22 }
  0x40   :  { %p3266_p2 = por %p3265_p1, %p3264_p0 }
  0x42   :  { %p3267_p3 = pnand %p3266_p2, %p3260_p13 }
  0x44   :  { %3270 = shalt.err (!%p3267_p3)
}
  0x45   :  { %s3399_s0 = smov 128   ;;  %s3400_s25 = smov 8  }
  0x46   :  { %62 = dma.hbm_to_vmem [thread:$0]  %s3824_s4, 2048, %s57_s14, [#allocation6], %s3399_s0, %s3399_s0, %s3400_s25  }
  0x47   :  { %s3401_s28 = smov [#allocation10]   ;;  %s3271_s19 = scalar_lea.hbm %s3828_s8, 16384 }
  0x48   :  { %s84_s29 = sshll.u32 %s3401_s28, 4  ;;  %p3272_p4 = scmp.ne.s32.totalorder %s3828_s8, %s3271_s19  ;;  %s85_s29 = int_to_ptr.vmem [resolvable:$true] %s84_s29 }
  0x49   :  { %p3275_p5 = scmp.lt.u32.totalorder %s3271_s19, %s3828_s8 }
  0x4b   :  { %p3277_p6 = pnand %p3275_p5, %p3272_p4 }
  0x4d   :  { %3280 = shalt.err (!%p3277_p6)
}
  0x4e   :  { %s3281_s26 = scalar_lea.vmem %s85_s29, 16384  ;;  %p3286_p8 = scmp.lt.s32.totalorder %s85_s29, %s85_s29 }
  0x4f   :  { %p3282_p7 = scmp.ne.s32.totalorder %s85_s29, %s3281_s26  ;;  %p3287_p9 = scmp.lt.s32.totalorder %s3281_s26, %s3281_s26 }
  0x51   :  { %p3288_p10 = por %p3287_p9, %p3286_p8 }
  0x53   :  { %p3289_p11 = pnand %p3288_p10, %p3282_p7 }
  0x55   :  { %3292 = shalt.err (!%p3289_p11)
}
  0x56   :  { %s3402_s4 = smov 1024  }
  0x57   :  { %90 = dma.hbm_to_vmem [thread:$0]  %s3828_s8, 16384, %s85_s29, [#allocation9], %s3402_s4, %s3402_s4, %s3394_s18  }
  0x58   :  { %3381 = dma.done.wait [#allocation3], 128  }
  0x59   :  { %3382 = vsyncadd [#allocation3], 4294967168 }
  0x5a   :  { %3383 = dma.done.wait [#allocation6], 10240  }
  0x5b   :  { %3384 = vsyncadd [#allocation6], 4294957056 }
  0x5c   :  { %3385 = dma.done.wait [#allocation9], 17408  }
  0x5d   :  { %3386 = vsyncadd [#allocation9], 4294949888  ;;  %v3046_v0 = vld [vmem:[#allocation5 + $0x40] sm:$0xff]   ;;  %v3050_v4 = vld [vmem:[#allocation5 + $0x48] sm:$0xff]   ;;  %v3403_v22 = vmov 1966171168   ;;  %v250_v24 = vlaneseq }
  0x5e   :  { %v3047_v1 = vld [vmem:[#allocation5 + $0xc0] sm:$0xff]   ;;  %2911 = vmatprep.subr.bf16.mxu0 %v3046_v0  ;;  %v3051_v5 = vld [vmem:[#allocation5 + $0xc8] sm:$0xff]   ;;  %v3054_v8 = vld [vmem:[#allocation5 + $0x50] sm:$0xff]   ;;  %v248_v23 = vunpack.c.l.s4 %v3403_v22  ;;  %vm3406_vm0 = vmmov 0   ;;  %vm2617_vm6 = vcmask 1041408   ;;  %s3407_s25 = smov [#allocation15]  }
  0x5f   :  { %v3048_v2 = vld [vmem:[#allocation5] sm:$0xff]   ;;  %2933 = vmatprep.subr.bf16.mxu1 %v3047_v1  ;;  %v3052_v6 = vld [vmem:[#allocation5 + $0x8] sm:$0xff]   ;;  %v3055_v9 = vld [vmem:[#allocation5 + $0xd0] sm:$0xff]   ;;  %v3547_v30 = vshrl.u32 %v250_v24, 7  ;;  %s2663_s24 = sshll.u32 %s3407_s25, 4  ;;  %s2664_s24 = int_to_ptr.vmem [resolvable:$true] %s2663_s24 }
  0x60   :  { %v3049_v3 = vld [vmem:[#allocation5 + $0x80] sm:$0xff]   ;;  %2912 = vmatpush3.bf16.msra.mxu0 %v3048_v2  ;;  %v3053_v7 = vld [vmem:[#allocation5 + $0x88] sm:$0xff]   ;;  %v3056_v10 = vld [vmem:[#allocation5 + $0x10] sm:$0xff]   ;;  %v249_v29 = vunpack.c.0.s8 %v248_v23  ;;  %s3293_s27 = scalar_lea.vmem %s2664_s24, 32  ;;  %p3298_p13 = scmp.lt.s32.totalorder %s2664_s24, %s2664_s24 }
  0x61   :  { %2934 = vmatpush3.bf16.msra.mxu1 %v3049_v3  ;;  %2913 = vmatprep.subr.bf16.mxu0 %v3050_v4  ;;  %v3057_v11 = vld [vmem:[#allocation5 + $0x90] sm:$0xff]   ;;  %v3058_v12 = vld [vmem:[#allocation5 + $0x58] sm:$0xff]   ;;  %v3062_v16 = vld [vmem:[#allocation5 + $0x60] sm:$0xff]   ;;  %p3294_p12 = scmp.ne.s32.totalorder %s2664_s24, %s3293_s27  ;;  %p3299_p0 = scmp.lt.s32.totalorder %s3293_s27, %s3293_s27 }
  0x62   :  { %2935 = vmatprep.subr.bf16.mxu1 %v3051_v5  ;;  %v3059_v13 = vld [vmem:[#allocation5 + $0xd8] sm:$0xff]   ;;  %v3063_v17 = vld [vmem:[#allocation5 + $0xe0] sm:$0xff]   ;;  %v3066_v20 = vld [vmem:[#allocation5 + $0x68] sm:$0xff]   ;;  %v3550_v35 = vsub.s32 %v249_v29, %v3547_v30 }
  0x63   :  { %v3060_v14 = vld [vmem:[#allocation5 + $0x18] sm:$0xff]   ;;  %v3064_v18 = vld [vmem:[#allocation5 + $0x20] sm:$0xff]   ;;  %v3067_v21 = vld [vmem:[#allocation5 + $0xe8] sm:$0xff]   ;;  %p3300_p1 = por %p3299_p0, %p3298_p13 }
  0x64   :  { %2914 = vmatpush3.bf16.msra.mxu0 %v3052_v6  ;;  %v3061_v15 = vld [vmem:[#allocation5 + $0x98] sm:$0xff]   ;;  %v3065_v19 = vld [vmem:[#allocation5 + $0xa0] sm:$0xff]   ;;  %v3068_v25 = vld [vmem:[#allocation5 + $0x28] sm:$0xff]  }
  0x65   :  { %2936 = vmatpush3.bf16.msra.mxu1 %v3053_v7  ;;  %2915 = vmatprep.subr.bf16.mxu0 %v3054_v8  ;;  %v3069_v26 = vld [vmem:[#allocation5 + $0xa8] sm:$0xff]   ;;  %v3070_v27 = vld [vmem:[#allocation5 + $0x70] sm:$0xff]   ;;  %v3074_v33 = vld [vmem:[#allocation5 + $0x78] sm:$0xff]   ;;  %p3301_p2 = pnand %p3300_p1, %p3294_p12 }
  0x66   :  { %2937 = vmatprep.subr.bf16.mxu1 %v3055_v9  ;;  %v3071_v28 = vld [vmem:[#allocation5 + $0xf0] sm:$0xff]   ;;  %v3075_v34 = vld [vmem:[#allocation5 + $0xf8] sm:$0xff]   ;;  %v3079_v41 = vld [vmem:[#allocation5 + $0x140] sm:$0xff]  }
  0x67   :  { %v3072_v31 = vld [vmem:[#allocation5 + $0x30] sm:$0xff]   ;;  %v3076_v36 = vld [vmem:[#allocation5 + $0x38] sm:$0xff]   ;;  %v3080_v42 = vld [vmem:[#allocation5 + $0x1c0] sm:$0xff]  }
  0x68   :  { %2916 = vmatpush3.bf16.msra.mxu0 %v3056_v10  ;;  %v3073_v32 = vld [vmem:[#allocation5 + $0xb0] sm:$0xff]   ;;  %v3077_v37 = vld [vmem:[#allocation5 + $0xb8] sm:$0xff]   ;;  %v3081_v46 = vld [vmem:[#allocation5 + $0x100] sm:$0xff]  }
  0x69   :  { %2938 = vmatpush3.bf16.msra.mxu1 %v3057_v11  ;;  %2917 = vmatprep.subr.bf16.mxu0 %v3058_v12  ;;  %v109_v38 = vld [vmem:[#allocation2] sm:$0xff]  ;;  %v3082_v48 = vld [vmem:[#allocation5 + $0x180] sm:$0xff]   ;;  %v3083_v51 = vld [vmem:[#allocation5 + $0x148] sm:$0xff]  }
  0x6a   :  { %2939 = vmatprep.subr.bf16.mxu1 %v3059_v13  ;;  %v246_v39 = vcombine.high %v109_v38, %v109_v38  ;;  %v253_v40 = vrot.slane %v109_v38, %v3550_v35  ;;  %v3084_v53 = vld [vmem:[#allocation5 + $0x1c8] sm:$0xff]   ;;  %v3087_v58 = vld [vmem:[#allocation5 + $0x150] sm:$0xff]   ;;  %v3091_v62 = vld [vmem:[#allocation5 + $0x158] sm:$0xff]  }
  0x6b   :  { %v3085_v55 = vld [vmem:[#allocation5 + $0x108] sm:$0xff]   ;;  %v3088_v59 = vld [vmem:[#allocation5 + $0x1d0] sm:$0xff]   ;;  %v3092_v63 = vld [vmem:[#allocation5 + $0x1d8] sm:$0xff]  }
  0x6c   :  { %2918 = vmatpush3.bf16.msra.mxu0 %v3060_v14  ;;  %v261_v43 = vcombine.high %v253_v40, %v253_v40  ;;  %v269_v44 = vrot.slane %v253_v40, %v3550_v35  ;;  %v3555_v45 = vrot.slane %v246_v39, %v3550_v35  ;;  %v3086_v56 = vld [vmem:[#allocation5 + $0x188] sm:$0xff]   ;;  %v3089_v60 = vld [vmem:[#allocation5 + $0x110] sm:$0xff]   ;;  %v3093_v0 = vld [vmem:[#allocation5 + $0x118] sm:$0xff]   ;;  %v3404_v39 = vmov 0  }
  0x6d   :  { %2940 = vmatpush3.bf16.msra.mxu1 %v3061_v15  ;;  %2919 = vmatprep.subr.bf16.mxu0 %v3062_v16  ;;  %v3090_v61 = vld [vmem:[#allocation5 + $0x190] sm:$0xff]   ;;  %v3094_v1 = vld [vmem:[#allocation5 + $0x198] sm:$0xff]   ;;  %v3095_v2 = vld [vmem:[#allocation5 + $0x160] sm:$0xff]  }
  0x6e   :  { %2941 = vmatprep.subr.bf16.mxu1 %v3063_v17  ;;  %v283_v47 = vrot.slane %v261_v43, %v3550_v35  ;;  %v262_v49 = vcombine.high %v3555_v45, %v3555_v45  ;;  %v291_v50 = vcombine.high %v269_v44, %v269_v44  ;;  %v3096_v3 = vld [vmem:[#allocation5 + $0x1e0] sm:$0xff]   ;;  %v3099_v6 = vld [vmem:[#allocation5 + $0x168] sm:$0xff]   ;;  %v3103_v10 = vld [vmem:[#allocation5 + $0x170] sm:$0xff]  }
  0x6f   :  { %v3097_v4 = vld [vmem:[#allocation5 + $0x120] sm:$0xff]   ;;  %v3100_v7 = vld [vmem:[#allocation5 + $0x1e8] sm:$0xff]   ;;  %v3104_v11 = vld [vmem:[#allocation5 + $0x1f0] sm:$0xff]  }
  0x70   :  { %2920 = vmatpush3.bf16.msra.mxu0 %v3064_v18  ;;  %719 = vmatprep.mubr.bf16.mxu0 %v283_v47  ;;  %v293_v52 = vcombine.high %v283_v47, %v283_v47  ;;  %v290_v54 = vrot.slane %v262_v49, %v3550_v35  ;;  %v3098_v5 = vld [vmem:[#allocation5 + $0x1a0] sm:$0xff]   ;;  %v3101_v8 = vld [vmem:[#allocation5 + $0x128] sm:$0xff]   ;;  %v3105_v12 = vld [vmem:[#allocation5 + $0x130] sm:$0xff]   ;;  %v276_v18 = vrot.slane %v3555_v45, %v3550_v35 }
  0x71   :  { %2942 = vmatpush3.bf16.msra.mxu1 %v3065_v19  ;;  %2921 = vmatprep.subr.bf16.mxu0 %v3066_v20  ;;  %v3102_v9 = vld [vmem:[#allocation5 + $0x1a8] sm:$0xff]   ;;  %v3106_v13 = vld [vmem:[#allocation5 + $0x1b0] sm:$0xff]   ;;  %v3107_v14 = vld [vmem:[#allocation5 + $0x178] sm:$0xff]  }
  0x72   :  { %2943 = vmatprep.subr.bf16.mxu1 %v3067_v21  ;;  %759 = vmatprep.mubr.bf16.mxu1 %v293_v52  ;;  %v294_v57 = vcombine.high %v290_v54, %v290_v54  ;;  %v3108_v15 = vld [vmem:[#allocation5 + $0x1f8] sm:$0xff]   ;;  %v292_v19 = vcombine.high %v276_v18, %v276_v18  ;;  %v3111_v20 = vld [vmem:[#allocation7] ss:$8 sps:$4 sm:$0xff]   ;;  %v3113_v21 = vld [vmem:[#allocation7 + $0x4] ss:$8 sps:$4 sm:$0xff]  }
  0x73   :  { %v3109_v16 = vld [vmem:[#allocation5 + $0x138] sm:$0xff]   ;;  %v3125_v29 = vld [vmem:[#allocation7 + $0x44] ss:$8 sps:$4 sm:$0xff]  }
  0x74   :  { %2922 = vmatpush3.bf16.msra.mxu0 %v3068_v25  ;;  %v3110_v17 = vld [vmem:[#allocation5 + $0x1b8] sm:$0xff]   ;;  %v3119_v25 = vld [vmem:[#allocation7 + $0x24] ss:$8 sps:$4 sm:$0xff]  }
  0x75   :  { %2944 = vmatpush3.bf16.msra.mxu1 %v3069_v26  ;;  %2923 = vmatprep.subr.bf16.mxu0 %v3070_v27  ;;  %v3116_v22 = vld [vmem:[#allocation7 + $0x14] ss:$8 sps:$4 sm:$0xff]   ;;  %v3114_v23 = vld [vmem:[#allocation7 + $0x10] ss:$8 sps:$4 sm:$0xff]   ;;  %v3117_v26 = vld [vmem:[#allocation7 + $0x20] ss:$8 sps:$4 sm:$0xff]  }
  0x76   :  { %2945 = vmatprep.subr.bf16.mxu1 %v3071_v28  ;;  %v3122_v27 = vld [vmem:[#allocation7 + $0x34] ss:$8 sps:$4 sm:$0xff]   ;;  %v3120_v28 = vld [vmem:[#allocation7 + $0x30] ss:$8 sps:$4 sm:$0xff]  }
  0x77   :  { %v3132_v38 = vld [vmem:[#allocation7 + $0x70] ss:$8 sps:$4 sm:$0xff]  }
  0x78   :  { %2924 = vmatpush3.bf16.msra.mxu0 %v3072_v31  ;;  %v3123_v31 = vld [vmem:[#allocation7 + $0x40] ss:$8 sps:$4 sm:$0xff]  }
  0x79   :  { %2946 = vmatpush3.bf16.msra.mxu1 %v3073_v32  ;;  %2925 = vmatprep.subr.bf16.mxu0 %v3074_v33  ;;  %v3128_v32 = vld [vmem:[#allocation7 + $0x54] ss:$8 sps:$4 sm:$0xff]   ;;  %v3126_v33 = vld [vmem:[#allocation7 + $0x50] ss:$8 sps:$4 sm:$0xff]  }
  0x7a   :  { %2947 = vmatprep.subr.bf16.mxu1 %v3075_v34  ;;  %v3131_v34 = vld [vmem:[#allocation7 + $0x64] ss:$8 sps:$4 sm:$0xff]  }
  0x7c   :  { %2926 = vmatpush3.bf16.msra.mxu0 %v3076_v36  ;;  %v3129_v36 = vld [vmem:[#allocation7 + $0x60] ss:$8 sps:$4 sm:$0xff]  }
  0x7d   :  { %2948 = vmatpush3.bf16.msra.mxu1 %v3077_v37  ;;  %2955 = vmatprep.subr.bf16.mxu0 %v3079_v41  ;;  %v3134_v37 = vld [vmem:[#allocation7 + $0x74] ss:$8 sps:$4 sm:$0xff]   ;;  %v2685_v41 = vld [vmem:[%s3823_s3] ss:$0 sm:$0xff] }
  0x7e   :  { %2977 = vmatprep.subr.bf16.mxu1 %v3080_v42 }
  0x7f   :  { %720 = vmatmul.mubr.bf16.vlgmr.msra.gmra.mrb[0].mxu0 %v269_v44 }
  0x80   :  { %2956 = vmatpush3.bf16.msra.mxu0 %v3081_v46  ;;  %760 = vmatmul.mubr.bf16.vlgmr.msra.gmra.mrb[0].mxu1 %v291_v50 }
  0x81   :  { %2957 = vmatprep.subr.bf16.mxu0 %v3083_v51  ;;  %2978 = vmatpush3.bf16.msra.mxu1 %v3082_v48 }
  0x82   :  { %799 = vmatprep.mubr.bf16.mxu0 %v290_v54  ;;  %2979 = vmatprep.subr.bf16.mxu1 %v3084_v53 }
  0x83   :  { %839 = vmatprep.mubr.bf16.mxu1 %v294_v57 }
  0x84   :  { %2958 = vmatpush3.bf16.msra.mxu0 %v3085_v55 }
  0x85   :  { %2959 = vmatprep.subr.bf16.mxu0 %v3087_v58  ;;  %2980 = vmatpush3.bf16.msra.mxu1 %v3086_v56 }
  0x86   :  { %2981 = vmatprep.subr.bf16.mxu1 %v3088_v59 }
  0x88   :  { %2960 = vmatpush3.bf16.msra.mxu0 %v3089_v60 }
  0x89   :  { %2961 = vmatprep.subr.bf16.mxu0 %v3091_v62  ;;  %2982 = vmatpush3.bf16.msra.mxu1 %v3090_v61 }
  0x8a   :  { %2983 = vmatprep.subr.bf16.mxu1 %v3092_v63 }
  0x8c   :  { %2962 = vmatpush3.bf16.msra.mxu0 %v3093_v0 }
  0x8d   :  { %2963 = vmatprep.subr.bf16.mxu0 %v3095_v2  ;;  %2984 = vmatpush3.bf16.msra.mxu1 %v3094_v1 }
  0x8e   :  { %2985 = vmatprep.subr.bf16.mxu1 %v3096_v3  ;;  %v3135_v3 = vld [vmem:[#allocation8] sm:$0xff]  }
  0x90   :  { %2964 = vmatpush3.bf16.msra.mxu0 %v3097_v4  ;;  %v3405_v4 = vmov 0.0  }
  0x91   :  { %2965 = vmatprep.subr.bf16.mxu0 %v3099_v6  ;;  %2986 = vmatpush3.bf16.msra.mxu1 %v3098_v5  ;;  %v3136_v5 = vld [vmem:[#allocation8 + $0x8] sm:$0xff]   ;;  %v3137_v6 = vld [vmem:[#allocation8 + $0x10] sm:$0xff]  }
  0x92   :  { %2987 = vmatprep.subr.bf16.mxu1 %v3100_v7  ;;  %v3138_v7 = vld [vmem:[#allocation8 + $0x18] sm:$0xff]  }
  0x94   :  { %2966 = vmatpush3.bf16.msra.mxu0 %v3101_v8  ;;  %v3139_v8 = vld [vmem:[#allocation8 + $0x20] sm:$0xff]  }
  0x95   :  { %2967 = vmatprep.subr.bf16.mxu0 %v3103_v10  ;;  %2988 = vmatpush3.bf16.msra.mxu1 %v3102_v9  ;;  %v3140_v9 = vld [vmem:[#allocation8 + $0x28] sm:$0xff]   ;;  %v3141_v10 = vld [vmem:[#allocation8 + $0x30] sm:$0xff]  }
  0x96   :  { %2989 = vmatprep.subr.bf16.mxu1 %v3104_v11  ;;  %v3142_v11 = vld [vmem:[#allocation8 + $0x38] sm:$0xff]  }
  0x98   :  { %2968 = vmatpush3.bf16.msra.mxu0 %v3105_v12  ;;  %v3569_v12 = vsub.s32 0, %v3547_v30 }
  0x99   :  { %2969 = vmatprep.subr.bf16.mxu0 %v3107_v14  ;;  %2990 = vmatpush3.bf16.msra.mxu1 %v3106_v13  ;;  %v865_v13 = vld [vmem:[%s3825_s5] sm:$0x3]  ;;  %v3575_v14 = vsub.s32 1, %v3547_v30 }
  0x9a   :  { %2991 = vmatprep.subr.bf16.mxu1 %v3108_v15  ;;  %v870_v15 = vrot.slane %v865_v13, %v3569_v12 }
  0x9c   :  { %2970 = vmatpush3.bf16.msra.mxu0 %v3109_v16  ;;  %v874_v16 = vrot.slane %v865_v13, %v3575_v14  ;;  %v1174_v13 = vld [vmem:[#allocation10 + $0x108] sm:$0xff] }
  0x9d   :  { %2992 = vmatpush3.bf16.msra.mxu1 %v3110_v17  ;;  %957 = vmatprep.subr.bf16.mxu0 %v3113_v21 }
  0x9e   :  { %3008 = vmatprep.subr.bf16.mxu1 %v3405_v4 }
  0x9f   :  { %800 = vmatmul.mubr.bf16.vlgmr.msra.gmra.mrb[4].mxu0 %v276_v18 }
  0xa0   :  { %840 = vmatmul.mubr.bf16.vlgmr.msra.gmra.mrb[4].mxu1 %v292_v19  ;;  %958 = vmatpush1.bf16.msra.mxu0 %v3111_v20 }
  0xa1   :  { %959 = vmatprep.subr.bf16.mxu0 %v3116_v22  ;;  %989 = vmatprep.mubr.bf16.mxu0 %v3404_v39 }
  0xa2   :  { %3009 = vmatpush3.bf16.msra.mxu1 %v3135_v3  ;;  %3024 = vmatprep.mubr.msk.bf16.mxu1 %vm3406_vm0, %v3405_v4  ;;  %v1165_v3 = vld [vmem:[#allocation10 + $0xc0] sm:$0xff] }
  0xa3   :  { %3010 = vmatprep.subr.bf16.mxu1 %v3405_v4 }
  0xa4   :  { %960 = vmatpush1.bf16.msra.mxu0 %v3114_v23 }
  0xa5   :  { %961 = vmatprep.subr.bf16.mxu0 %v3119_v25 }
  0xa6   :  { %3011 = vmatpush3.bf16.msra.mxu1 %v3136_v5 }
  0xa7   :  { %3012 = vmatprep.subr.bf16.mxu1 %v3405_v4 }
  0xa8   :  { %962 = vmatpush1.bf16.msra.mxu0 %v3117_v26 }
  0xa9   :  { %963 = vmatprep.subr.bf16.mxu0 %v3122_v27 }
  0xaa   :  { %3013 = vmatpush3.bf16.msra.mxu1 %v3137_v6 }
  0xab   :  { %3014 = vmatprep.subr.bf16.mxu1 %v3405_v4 }
  0xac   :  { %964 = vmatpush1.bf16.msra.mxu0 %v3120_v28 }
  0xad   :  { %965 = vmatprep.subr.bf16.mxu0 %v3125_v29 }
  0xae   :  { %3015 = vmatpush3.bf16.msra.mxu1 %v3138_v7  ;;  %v1158_v7 = vld [vmem:[#allocation10 + $0x88] sm:$0xff] }
  0xaf   :  { %3016 = vmatprep.subr.bf16.mxu1 %v3405_v4 }
  0xb0   :  { %966 = vmatpush1.bf16.msra.mxu0 %v3123_v31 }
  0xb1   :  { %967 = vmatprep.subr.bf16.mxu0 %v3128_v32 }
  0xb2   :  { %3017 = vmatpush3.bf16.msra.mxu1 %v3139_v8  ;;  %v1166_v8 = vld [vmem:[#allocation10 + $0xc8] sm:$0xff] }
  0xb3   :  { %3018 = vmatprep.subr.bf16.mxu1 %v3405_v4 }
  0xb4   :  { %968 = vmatpush1.bf16.msra.mxu0 %v3126_v33 }
  0xb5   :  { %969 = vmatprep.subr.bf16.mxu0 %v3131_v34 }
  0xb6   :  { %3019 = vmatpush3.bf16.msra.mxu1 %v3140_v9  ;;  %v1173_v9 = vld [vmem:[#allocation10 + $0x100] sm:$0xff] }
  0xb7   :  { %3020 = vmatprep.subr.bf16.mxu1 %v3405_v4 }
  0xb8   :  { %970 = vmatpush1.bf16.msra.mxu0 %v3129_v36 }
  0xb9   :  { %971 = vmatprep.subr.bf16.mxu0 %v3134_v37 }
  0xba   :  { %3021 = vmatpush3.bf16.msra.mxu1 %v3141_v10  ;;  %v2794_v10 = vcombine.high %v1158_v7, %v1166_v8 }
  0xbb   :  { %3022 = vmatprep.subr.bf16.mxu1 %v3405_v4 }
  0xbc   :  { %972 = vmatpush1.bf16.msra.mxu0 %v3132_v38 }
  0xbe   :  { %3023 = vmatpush3.bf16.msra.mxu1 %v3142_v11  ;;  %v1181_v11 = vld [vmem:[#allocation10 + $0x140] sm:$0xff] }
 0x152   :  { %v2927_v40 = vpop.f32.mrb[0].mxu0 }
 0x153   :  { %v2928_v42 = vpop.f32.mrb[1].mxu0  ;;  %v2949_v43 = vpop.f32.mrb[0].mxu1 }
 0x154   :  { %v2929_v44 = vadd.f32 %v2928_v42, %v2927_v40  ;;  %v2930_v45 = vpop.f32.mrb[2].mxu0  ;;  %v2950_v46 = vpop.f32.mrb[1].mxu1 }
 0x155   :  { %v2931_v47 = vpop.f32.mrb[3].mxu0  ;;  %v2951_v49 = vadd.f32 %v2950_v46, %v2949_v43  ;;  %v2952_v50 = vpop.f32.mrb[2].mxu1  ;;  %v1017_v46 = vld [vmem:[%s3821_s1] sm:$0x3] }
 0x156   :  { %v722_v48 = vadd.f32 %v2929_v44, %v2685_v41  ;;  %v2953_v51 = vpop.f32.mrb[3].mxu1  ;;  %v3592_v50 = vand.u32 127, %v250_v24  ;;  %v1141_v24 = vld [vmem:[#allocation10] sm:$0xff] }
 0x158   :  { %v762_v52 = vadd.f32 %v2951_v49, %v722_v48  ;;  %vm2609_vm5 = vcmp.lt.s32.totalorder %v3592_v50, 8  ;;  %vm2623_vm7 = vcmp.eq.s32.totalorder %v3592_v50, 8 }
 0x172   :  { %v2971_v53 = vpop.f32.mrb[4].mxu0 }
 0x173   :  { %v2972_v54 = vpop.f32.mrb[5].mxu0  ;;  %v2993_v55 = vpop.f32.mrb[4].mxu1 }
 0x174   :  { %v2973_v56 = vadd.f32 %v2972_v54, %v2971_v53  ;;  %v2974_v57 = vpop.f32.mrb[6].mxu0  ;;  %v2994_v58 = vpop.f32.mrb[5].mxu1 }
 0x175   :  { %v2975_v59 = vpop.f32.mrb[7].mxu0  ;;  %v2995_v61 = vadd.f32 %v2994_v58, %v2993_v55  ;;  %v2996_v62 = vpop.f32.mrb[6].mxu1 }
 0x176   :  { %v802_v60 = vadd.f32 %v2973_v56, %v762_v52  ;;  %v2997_v63 = vpop.f32.mrb[7].mxu1  ;;  %v1142_v62 = vld [vmem:[#allocation10 + $0x8] sm:$0xff] }
 0x178   :  { %v842_v0 = vadd.f32 %v2995_v61, %v802_v60  ;;  %v1149_v61 = vld [vmem:[#allocation10 + $0x40] sm:$0xff] }
 0x179   :  { %v2775_v63 = vcombine.low %v1141_v24, %v1149_v61 }
 0x17a   :  { %v847_v1 = vmax.f32 %v842_v0, 0.0  ;;  %v2776_v0 = vcombine.high %v1141_v24, %v1149_v61  ;;  %v1261_v24 = vld [vmem:[#allocation10 + $0x3c0] sm:$0xff]  ;;  %v1254_v61 = vld [vmem:[#allocation10 + $0x388] sm:$0xff] }
 0x17c   :  { %v848_v2 = vpack.c.bf16 %v847_v1, %v847_v1  ;;  %v1150_v1 = vld [vmem:[#allocation10 + $0x48] sm:$0xff]  ;;  %1993 = vmatprep.subr.bf16.mxu0 %v2776_v0 }
 0x17d   :  { %v2777_v4 = vcombine.low %v1142_v62, %v1150_v1  ;;  %v2778_v5 = vcombine.high %v1142_v62, %v1150_v1 }
 0x17e   :  { %990 = vmatmul.mubr.bf16.vlgmr.msra.gmra.mrb[8].mxu0 %v848_v2  ;;  %v1157_v2 = vld [vmem:[#allocation10 + $0x80] sm:$0xff] }
 0x17f   :  { %2025 = vmatprep.mubr.bf16.mxu0 %v3404_v39  ;;  %v2792_v6 = vcombine.high %v1157_v2, %v1165_v3  ;;  %2034 = vmatprep.subr.bf16.mxu1 %v2778_v5  ;;  %v1144_v5 = vld [vmem:[#allocation10 + $0x18] sm:$0xff] }
 0x180   :  { %1994 = vmatpush1.bf16.msra.mxu0 %v2775_v63  ;;  %v1262_v63 = vld [vmem:[#allocation10 + $0x3c8] sm:$0xff] }
 0x181   :  { %1995 = vmatprep.subr.bf16.mxu0 %v2792_v6  ;;  %v2889_v1 = vcombine.low %v1254_v61, %v1262_v63 }
 0x251   :  { %v991_v17 = vpop.f32.mrb[8].mxu0 }
 0x252   :  { %v992_v18 = vadd.f32 %v991_v17, %v870_v15  ;;  %v993_v19 = vpop.f32.mrb[9].mxu0  ;;  %v1182_v15 = vld [vmem:[#allocation10 + $0x148] sm:$0xff]  ;;  %v2793_v17 = vcombine.low %v1158_v7, %v1166_v8  ;;  %v1152_v8 = vld [vmem:[#allocation10 + $0x58] sm:$0xff] }
 0x253   :  { %v994_v20 = vadd.f32 %v993_v19, %v874_v16  ;;  %v995_v21 = vpop.f32.mrb[10].mxu0  ;;  %v2791_v16 = vcombine.low %v1157_v2, %v1165_v3  ;;  %v2810_v19 = vcombine.high %v1174_v13, %v1182_v15  ;;  %v2890_v2 = vcombine.high %v1254_v61, %v1262_v63  ;;  %v1143_v3 = vld [vmem:[#allocation10 + $0x10] sm:$0xff]  ;;  %v1232_v61 = vld [vmem:[#allocation10 + $0x2d8] sm:$0xff] }
 0x254   :  { %2622 = vst [vmem:[#allocation14] sm:$0x3] %v992_v18  ;;  %v996_v22 = vpop.f32.mrb[11].mxu0  ;;  %v2613_v51 = vmul.f32 %v992_v18, %v992_v18  ;;  %v1197_v21 = vld [vmem:[#allocation10 + $0x1c0] sm:$0xff] }
 0x255   :  { %v1001_v23 = vand.u32 2147483647, %v994_v20  ;;  %v998_v37 = vmax.f32 %v994_v20, 0.0  ;;  %vm999_vm2 = vcmp.ne.f32.partialorder %v994_v20, %v994_v20  ;;  %v1190_v22 = vld [vmem:[#allocation10 + $0x188] sm:$0xff]  ;;  %1996 = vmatpush1.bf16.msra.mxu0 %v2791_v16 }
 0x257   :  { %v1002_v25 = vsub.f32 0.0, %v1001_v23  ;;  %v1198_v23 = vld [vmem:[#allocation10 + $0x1c8] sm:$0xff] }
 0x259   :  { %v1003_v26 = vmul.f32 1.442695, %v1002_v25  ;;  %v2807_v25 = vcombine.low %v1173_v9, %v1181_v11 }
 0x25b   :  { %3143 = vpow2.f32 %v1003_v26  ;;  %v2809_v26 = vcombine.low %v1174_v13, %v1182_v15 }
 0x265   :  { %v3144_v27 = vpop.eup %3143 }
 0x266   :  { %v1005_v28 = vadd.f32 1.0, %v3144_v27  ;;  %v1008_v29 = vmul.f32 -0.5, %v3144_v27  ;;  %v1011_v32 = vand.u32 2147483647, %v3144_v27 }
 0x268   :  { %3145 = vlog2.f32 %v1005_v28  ;;  %v1009_v31 = vadd.f32 1.0, %v1008_v29  ;;  %vm1012_vm1 = vcmp.lt.f32.partialorder %v1011_v32, 0.0004427343  ;;  %v2826_v28 = vcombine.high %v1190_v22, %v1198_v23  ;;  %v1205_v29 = vld [vmem:[#allocation10 + $0x200] sm:$0xff]  ;;  %v1206_v32 = vld [vmem:[#allocation10 + $0x208] sm:$0xff] }
 0x26a   :  { %v1010_v36 = vmul.f32 %v3144_v27, %v1009_v31  ;;  %v1213_v31 = vld [vmem:[#allocation10 + $0x240] sm:$0xff] }
 0x272   :  { %v3146_v33 = vpop.eup %3145 }
 0x273   :  { %v1007_v34 = vmul.f32 0.6931472, %v3146_v33  ;;  %v1214_v33 = vld [vmem:[#allocation10 + $0x248] sm:$0xff] }
 0x275   :  { %v1013_v38 = vsel %vm1012_vm1, %v1010_v36, %v1007_v34  ;;  %v2825_v36 = vcombine.low %v1190_v22, %v1198_v23  ;;  %v1167_v23 = vld [vmem:[#allocation10 + $0xd0] sm:$0xff] }
 0x276   :  { %v1014_v40 = vadd.f32 %v1013_v38, %v998_v37  ;;  %v2840_v37 = vcombine.high %v1205_v29, %v1213_v31  ;;  %v2842_v38 = vcombine.high %v1206_v32, %v1214_v33 }
 0x278   :  { %v1015_v41 = vsel %vm999_vm2, %v994_v20, %v1014_v40  ;;  %v1189_v20 = vld [vmem:[#allocation10 + $0x180] sm:$0xff] }
 0x279   :  { %v3579_v42 = vadd.f32 1e-06, %v1015_v41  ;;  %v2824_v27 = vcombine.high %v1189_v20, %v1197_v21  ;;  %v2823_v34 = vcombine.low %v1189_v20, %v1197_v21  ;;  %v1221_v40 = vld [vmem:[#allocation10 + $0x280] sm:$0xff]  ;;  %v1159_v21 = vld [vmem:[#allocation10 + $0x90] sm:$0xff] }
 0x27a   :  { %v1229_v41 = vld [vmem:[#allocation10 + $0x2c0] sm:$0xff] }
 0x27b   :  { %3147 = vrsqrt.f32 %v3579_v42  ;;  %vm1020_vm3 = vcmp.eq.f32.partialorder %v3579_v42, inf  ;;  %v1023_v47 = vand.u32 2147483648, %v3579_v42  ;;  %vm1022_vm4 = vcmp.eq.f32.partialorder %v3579_v42, 0.0 }
 0x27c   :  { %3149 = vlog2.f32 %v3579_v42 }
 0x285   :  { %v3148_v43 = vpop.eup %3147 }
 0x286   :  { %v3150_v44 = vpop.eup %3149  ;;  %v1019_v45 = vmul.f32 %v3148_v43, %v3579_v42  ;;  %v1222_v43 = vld [vmem:[#allocation10 + $0x288] sm:$0xff] }
 0x287   :  { %v2611_v48 = vmul.f32 0.6931472, %v3150_v44  ;;  %v1230_v44 = vld [vmem:[#allocation10 + $0x2c8] sm:$0xff] }
 0x288   :  { %v1021_v49 = vsel %vm1020_vm3, %v3579_v42, %v1019_v45  ;;  %v2839_v45 = vcombine.low %v1205_v29, %v1213_v31  ;;  %v2796_v31 = vcombine.high %v1159_v21, %v1167_v23 }
 0x289   :  { %v1024_v52 = vsel %vm1022_vm4, %v1023_v47, %v1021_v49  ;;  %v2612_v53 = vadd.f32 1.0, %v2611_v48  ;;  %v2856_v47 = vcombine.high %v1221_v40, %v1229_v41  ;;  %v2858_v48 = vcombine.high %v1222_v43, %v1230_v44  ;;  %v1237_v49 = vld [vmem:[#allocation10 + $0x300] sm:$0xff] }
 0x28a   :  { %v1025_v54 = vmul.f32 %v1024_v52, %v1017_v46  ;;  %v2841_v46 = vcombine.low %v1206_v32, %v1214_v33  ;;  %v1238_v52 = vld [vmem:[#allocation10 + $0x308] sm:$0xff]  ;;  %v1183_v32 = vld [vmem:[#allocation10 + $0x150] sm:$0xff]  ;;  %v1176_v33 = vld [vmem:[#allocation10 + $0x118] sm:$0xff] }
 0x28b   :  { %v2614_v55 = vsub.f32 %v2612_v53, %v2613_v51  ;;  %v1245_v51 = vld [vmem:[#allocation10 + $0x340] sm:$0xff]  ;;  %v1246_v53 = vld [vmem:[#allocation10 + $0x348] sm:$0xff] }
 0x28c   :  { %v1026_v56 = vadd.f32 %v1025_v54, %v992_v18  ;;  %v2808_v18 = vcombine.high %v1173_v9, %v1181_v11  ;;  %v2855_v54 = vcombine.low %v1221_v40, %v1229_v41  ;;  %v2781_v9 = vcombine.low %v1144_v5, %v1152_v8  ;;  %v1191_v41 = vld [vmem:[#allocation10 + $0x190] sm:$0xff] }
 0x28d   :  { %v2615_v57 = vsub.f32 %v2614_v55, %v3579_v42  ;;  %v2857_v55 = vcombine.low %v1222_v43, %v1230_v44  ;;  %v1199_v43 = vld [vmem:[#allocation10 + $0x1d0] sm:$0xff]  ;;  %v1192_v44 = vld [vmem:[#allocation10 + $0x198] sm:$0xff] }
 0x28e   :  { %v1027_v58 = vpack.c.bf16 %v1026_v56, %v1026_v56  ;;  %1997 = vmatprep.subr.bf16.mxu0 %v2808_v18  ;;  %v2872_v56 = vcombine.high %v1237_v49, %v1245_v51 }
 0x28f   :  { %v2616_v59 = vsel %vm2609_vm5, %v2615_v57, 0.0  ;;  %1998 = vmatpush1.bf16.msra.mxu0 %v2807_v25  ;;  %v2874_v57 = vcombine.high %v1238_v52, %v1246_v53  ;;  %v1160_v25 = vld [vmem:[#allocation10 + $0x98] sm:$0xff] }
 0x290   :  { %3025 = vmatmul.mubr.bf16.vlgmr.msra.gmra.mrb[8].mxu1 %v1027_v58  ;;  %v2618_v60 = vsel %vm2617_vm6, %v2616_v59, 0.0  ;;  %1999 = vmatprep.subr.bf16.mxu0 %v2824_v27  ;;  %v2871_v58 = vcombine.low %v1237_v49, %v1245_v51  ;;  %v2873_v59 = vcombine.low %v1238_v52, %v1246_v53  ;;  %v1207_v51 = vld [vmem:[#allocation10 + $0x210] sm:$0xff]  ;;  %v1208_v53 = vld [vmem:[#allocation10 + $0x218] sm:$0xff] }
 0x291   :  { %2619 = vadd.xlane.f32.xlu0 %v2618_v60  ;;  %2066 = vmatprep.mubr.bf16.mxu1 %v3404_v39  ;;  %v1253_v60 = vld [vmem:[#allocation10 + $0x380] sm:$0xff]  ;;  %v1215_v52 = vld [vmem:[#allocation10 + $0x250] sm:$0xff] }
 0x292   :  { %2035 = vmatpush1.bf16.msra.mxu1 %v2777_v4  ;;  %v2888_v62 = vcombine.high %v1253_v60, %v1261_v24  ;;  %v2887_v0 = vcombine.low %v1253_v60, %v1261_v24  ;;  %v1151_v4 = vld [vmem:[#allocation10 + $0x50] sm:$0xff]  ;;  %v1224_v24 = vld [vmem:[#allocation10 + $0x298] sm:$0xff] }
 0x293   :  { %2036 = vmatprep.subr.bf16.mxu1 %v2794_v10  ;;  %2000 = vmatpush1.bf16.msra.mxu0 %v2823_v34  ;;  %v2779_v6 = vcombine.low %v1143_v3, %v1151_v4  ;;  %v2780_v7 = vcombine.high %v1143_v3, %v1151_v4  ;;  %v2782_v10 = vcombine.high %v1144_v5, %v1152_v8  ;;  %v1184_v34 = vld [vmem:[#allocation10 + $0x158] sm:$0xff]  ;;  %v1231_v60 = vld [vmem:[#allocation10 + $0x2d0] sm:$0xff] }
 0x294   :  { %2001 = vmatprep.subr.bf16.mxu0 %v2840_v37  ;;  %v2814_v40 = vcombine.high %v1176_v33, %v1184_v34  ;;  %v1247_v3 = vld [vmem:[#allocation10 + $0x350] sm:$0xff]  ;;  %v1240_v4 = vld [vmem:[#allocation10 + $0x318] sm:$0xff] }
 0x295   :  { %v1248_v5 = vld [vmem:[#allocation10 + $0x358] sm:$0xff] }
 0x296   :  { %2037 = vmatpush1.bf16.msra.mxu1 %v2793_v17  ;;  %v2766_v17 = vld [vmem:[%s3827_s7] ss:$0 sm:$0xff] }
 0x297   :  { %2038 = vmatprep.subr.bf16.mxu1 %v2810_v19  ;;  %2002 = vmatpush1.bf16.msra.mxu0 %v2839_v45  ;;  %v1200_v45 = vld [vmem:[#allocation10 + $0x1d8] sm:$0xff] }
 0x298   :  { %2003 = vmatprep.subr.bf16.mxu0 %v2856_v47  ;;  %v2813_v47 = vcombine.low %v1176_v33, %v1184_v34  ;;  %v2830_v49 = vcombine.high %v1192_v44, %v1200_v45 }
 0x29a   :  { %2039 = vmatpush1.bf16.msra.mxu1 %v2809_v26  ;;  %v1168_v26 = vld [vmem:[#allocation10 + $0xd8] sm:$0xff] }
 0x29b   :  { %2040 = vmatprep.subr.bf16.mxu1 %v2826_v28  ;;  %2004 = vmatpush1.bf16.msra.mxu0 %v2855_v54  ;;  %v2798_v50 = vcombine.high %v1160_v25, %v1168_v26  ;;  %v2797_v37 = vcombine.low %v1160_v25, %v1168_v26  ;;  %v1216_v54 = vld [vmem:[#allocation10 + $0x258] sm:$0xff] }
 0x29c   :  { %2005 = vmatprep.subr.bf16.mxu0 %v2872_v56  ;;  %v2829_v56 = vcombine.low %v1192_v44, %v1200_v45  ;;  %v2845_v63 = vcombine.low %v1208_v53, %v1216_v54 }
 0x29e   :  { %2041 = vmatpush1.bf16.msra.mxu1 %v2825_v36  ;;  %v2795_v36 = vcombine.low %v1159_v21, %v1167_v23  ;;  %v1153_v21 = vld [vmem:[#allocation10 + $0x60] sm:$0xff]  ;;  %v1154_v23 = vld [vmem:[#allocation10 + $0x68] sm:$0xff] }
 0x29f   :  { %2042 = vmatprep.subr.bf16.mxu1 %v2842_v38  ;;  %2006 = vmatpush1.bf16.msra.mxu0 %v2871_v58  ;;  %v2846_v58 = vcombine.high %v1208_v53, %v1216_v54 }
 0x2a0   :  { %2007 = vmatprep.subr.bf16.mxu0 %v2888_v62  ;;  %v2843_v62 = vcombine.low %v1207_v51, %v1215_v52 }
 0x2a2   :  { %2043 = vmatpush1.bf16.msra.mxu1 %v2841_v46 }
 0x2a3   :  { %2044 = vmatprep.subr.bf16.mxu1 %v2858_v48  ;;  %2008 = vmatpush1.bf16.msra.mxu0 %v2887_v0  ;;  %v2828_v48 = vcombine.high %v1191_v41, %v1199_v43 }
 0x2a4   :  { %2075 = vmatprep.subr.bf16.mxu0 %v2780_v7  ;;  %v2861_v7 = vcombine.low %v1224_v24, %v1232_v61 }
 0x2a6   :  { %2045 = vmatpush1.bf16.msra.mxu1 %v2857_v55  ;;  %v2827_v55 = vcombine.low %v1191_v41, %v1199_v43  ;;  %v1178_v41 = vld [vmem:[#allocation10 + $0x128] sm:$0xff] }
 0x2a7   :  { %2046 = vmatprep.subr.bf16.mxu1 %v2874_v57  ;;  %v2844_v57 = vcombine.high %v1207_v51, %v1215_v52  ;;  %v1186_v43 = vld [vmem:[#allocation10 + $0x168] sm:$0xff] }
 0x2a8   :  { %v1194_v51 = vld [vmem:[#allocation10 + $0x1a8] sm:$0xff]  ;;  %v2817_v54 = vcombine.low %v1178_v41, %v1186_v43 }
 0x2a9   :  { %v1202_v52 = vld [vmem:[#allocation10 + $0x1e8] sm:$0xff] }
 0x2aa   :  { %2047 = vmatpush1.bf16.msra.mxu1 %v2873_v59  ;;  %v1223_v59 = vld [vmem:[#allocation10 + $0x290] sm:$0xff] }
 0x2ab   :  { %2048 = vmatprep.subr.bf16.mxu1 %v2890_v2  ;;  %v2860_v0 = vcombine.high %v1223_v59, %v1231_v60  ;;  %v1239_v2 = vld [vmem:[#allocation10 + $0x310] sm:$0xff] }
 0x2ac   :  { %v2876_v8 = vcombine.high %v1239_v2, %v1247_v3 }
 0x2ae   :  { %2049 = vmatpush1.bf16.msra.mxu1 %v2889_v1  ;;  %v2862_v1 = vcombine.high %v1224_v24, %v1232_v61  ;;  %v2833_v61 = vcombine.low %v1194_v51, %v1202_v52 }
 0x2af   :  { %2116 = vmatprep.subr.bf16.mxu1 %v2782_v10  ;;  %v1255_v10 = vld [vmem:[#allocation10 + $0x390] sm:$0xff] }
 0x31e   :  { %v2620_v11 = vpop.xlane.xlu0 %2619 }
 0x31f   :  { %v2621_v13 = vmul.f32 -0.5, %v2620_v11  ;;  %v1263_v11 = vld [vmem:[#allocation10 + $0x3d0] sm:$0xff] }
 0x320   :  { %v2891_v25 = vcombine.low %v1255_v10, %v1263_v11 }
 0x321   :  { %v2624_v15 = vsel %vm2623_vm7, %v2621_v13, 0.0  ;;  %v1256_v13 = vld [vmem:[#allocation10 + $0x398] sm:$0xff] }
 0x322   :  { %v2625_v16 = vsel %vm2609_vm5, %v3579_v42, %v2624_v15  ;;  %v1175_v42 = vld [vmem:[#allocation10 + $0x110] sm:$0xff]  ;;  %v1264_v15 = vld [vmem:[#allocation10 + $0x3d8] sm:$0xff] }
 0x323   :  { %2626 = vst [vmem:[#allocation15] sm:$0x3] %v2625_v16  ;;  %v2812_v38 = vcombine.high %v1175_v42, %v1183_v32  ;;  %v2811_v46 = vcombine.low %v1175_v42, %v1183_v32  ;;  %v2875_v16 = vcombine.low %v1239_v2, %v1247_v3  ;;  %v2893_v26 = vcombine.low %v1256_v13, %v1264_v15  ;;  %v1162_v42 = vld [vmem:[#allocation10 + $0xa8] sm:$0xff] }
 0x324   :  { %v1170_v32 = vld [vmem:[#allocation10 + $0xe8] sm:$0xff] }
 0x325   :  { %v2801_v45 = vcombine.low %v1162_v42, %v1170_v32  ;;  %v1226_v2 = vld [vmem:[#allocation10 + $0x2a8] sm:$0xff] }
 0x326   :  { %v1234_v3 = vld [vmem:[#allocation10 + $0x2e8] sm:$0xff] }
 0x363   :  { %v1133_v18 = vpop.f32.mrb[8].mxu1 }
 0x364   :  { %v1134_v19 = vadd.f32 %v2766_v17, %v1133_v18  ;;  %v3026_v20 = vpop.f32.mrb[9].mxu1  ;;  %v2877_v17 = vcombine.low %v1240_v4, %v1248_v5  ;;  %v2892_v18 = vcombine.high %v1255_v10, %v1263_v11  ;;  %v1242_v10 = vld [vmem:[#allocation10 + $0x328] sm:$0xff] }
 0x365   :  { %v1136_v22 = vpop.f32.mrb[10].mxu1  ;;  %v1145_v20 = vld [vmem:[#allocation10 + $0x20] sm:$0xff]  ;;  %v1250_v11 = vld [vmem:[#allocation10 + $0x368] sm:$0xff] }
 0x366   :  { %v1139_v27 = vmax.f32 %v1134_v19, 0.0  ;;  %v3027_v28 = vpop.f32.mrb[11].mxu1  ;;  %v2894_v19 = vcombine.high %v1256_v13, %v1264_v15  ;;  %v1146_v22 = vld [vmem:[#allocation10 + $0x28] sm:$0xff]  ;;  %v2783_v33 = vcombine.low %v1145_v20, %v1153_v21  ;;  %v2865_v15 = vcombine.low %v1226_v2, %v1234_v3 }
 0x367   :  { %v2786_v28 = vcombine.high %v1146_v22, %v1154_v23  ;;  %v2785_v34 = vcombine.low %v1146_v22, %v1154_v23  ;;  %v2881_v23 = vcombine.low %v1242_v10, %v1250_v11 }
 0x368   :  { %v3606_v29 = vpack.c.bf16 %v1139_v27, %v1139_v27  ;;  %v2784_v27 = vcombine.high %v1145_v20, %v1153_v21  ;;  %v1258_v20 = vld [vmem:[#allocation10 + $0x3a8] sm:$0xff] }
 0x369   :  { %v1266_v21 = vld [vmem:[#allocation10 + $0x3e8] sm:$0xff] }
 0x36a   :  { %2026 = vmatmul.mubr.bf16.vlgmr.msra.gmra.mrb[12].mxu0 %v3606_v29  ;;  %2067 = vmatmul.mubr.bf16.vlgmr.msra.gmra.mrb[12].mxu1 %v3606_v29 }
 0x36b   :  { %2076 = vmatpush1.bf16.msra.mxu0 %v2779_v6  ;;  %2117 = vmatpush1.bf16.msra.mxu1 %v2781_v9  ;;  %v2859_v6 = vcombine.low %v1223_v59, %v1231_v60  ;;  %v2878_v9 = vcombine.high %v1240_v4, %v1248_v5  ;;  %v1210_v59 = vld [vmem:[#allocation10 + $0x228] sm:$0xff] }
 0x36c   :  { %2077 = vmatprep.subr.bf16.mxu0 %v2796_v31  ;;  %2118 = vmatprep.subr.bf16.mxu1 %v2798_v50  ;;  %v1161_v31 = vld [vmem:[#allocation10 + $0xa0] sm:$0xff]  ;;  %v1218_v60 = vld [vmem:[#allocation10 + $0x268] sm:$0xff] }
 0x36d   :  { %2107 = vmatprep.mubr.bf16.mxu0 %v3404_v39  ;;  %2148 = vmatprep.mubr.bf16.mxu1 %v3404_v39  ;;  %v1169_v50 = vld [vmem:[#allocation10 + $0xe0] sm:$0xff]  ;;  %v2849_v5 = vcombine.low %v1210_v59, %v1218_v60 }
 0x36e   :  { %v2799_v44 = vcombine.low %v1161_v31, %v1169_v50 }
 0x36f   :  { %2078 = vmatpush1.bf16.msra.mxu0 %v2795_v36  ;;  %2119 = vmatpush1.bf16.msra.mxu1 %v2797_v37  ;;  %v2800_v36 = vcombine.high %v1161_v31, %v1169_v50  ;;  %v2802_v37 = vcombine.high %v1162_v42, %v1170_v32  ;;  %v1148_v31 = vld [vmem:[#allocation10 + $0x38] sm:$0xff]  ;;  %v2897_v32 = vcombine.low %v1258_v20, %v1266_v21 }
 0x370   :  { %2079 = vmatprep.subr.bf16.mxu0 %v2812_v38  ;;  %2120 = vmatprep.subr.bf16.mxu1 %v2814_v40  ;;  %v1177_v38 = vld [vmem:[#allocation10 + $0x120] sm:$0xff]  ;;  %v1156_v50 = vld [vmem:[#allocation10 + $0x78] sm:$0xff] }
 0x371   :  { %v1185_v40 = vld [vmem:[#allocation10 + $0x160] sm:$0xff] }
 0x372   :  { %v2815_v53 = vcombine.low %v1177_v38, %v1185_v40 }
 0x373   :  { %2080 = vmatpush1.bf16.msra.mxu0 %v2811_v46  ;;  %2121 = vmatpush1.bf16.msra.mxu1 %v2813_v47  ;;  %v2816_v46 = vcombine.high %v1177_v38, %v1185_v40  ;;  %v2818_v47 = vcombine.high %v1178_v41, %v1186_v43  ;;  %v1164_v38 = vld [vmem:[#allocation10 + $0xb8] sm:$0xff]  ;;  %v2789_v43 = vcombine.low %v1148_v31, %v1156_v50 }
 0x374   :  { %2081 = vmatprep.subr.bf16.mxu0 %v2828_v48  ;;  %2122 = vmatprep.subr.bf16.mxu1 %v2830_v49  ;;  %v1193_v48 = vld [vmem:[#allocation10 + $0x1a0] sm:$0xff]  ;;  %v1172_v40 = vld [vmem:[#allocation10 + $0xf8] sm:$0xff] }
 0x375   :  { %v1201_v49 = vld [vmem:[#allocation10 + $0x1e0] sm:$0xff] }
 0x376   :  { %v2831_v24 = vcombine.low %v1193_v48, %v1201_v49 }
 0x377   :  { %2082 = vmatpush1.bf16.msra.mxu0 %v2827_v55  ;;  %2123 = vmatpush1.bf16.msra.mxu1 %v2829_v56  ;;  %v2832_v55 = vcombine.high %v1193_v48, %v1201_v49  ;;  %v2834_v56 = vcombine.high %v1194_v51, %v1202_v52  ;;  %v1180_v48 = vld [vmem:[#allocation10 + $0x138] sm:$0xff]  ;;  %v2805_v52 = vcombine.low %v1164_v38, %v1172_v40 }
 0x378   :  { %2083 = vmatprep.subr.bf16.mxu0 %v2844_v57  ;;  %2124 = vmatprep.subr.bf16.mxu1 %v2846_v58  ;;  %v1209_v57 = vld [vmem:[#allocation10 + $0x220] sm:$0xff]  ;;  %v1188_v49 = vld [vmem:[#allocation10 + $0x178] sm:$0xff] }
 0x379   :  { %v1217_v58 = vld [vmem:[#allocation10 + $0x260] sm:$0xff] }
 0x37a   :  { %v2847_v4 = vcombine.low %v1209_v57, %v1217_v58 }
 0x37b   :  { %2084 = vmatpush1.bf16.msra.mxu0 %v2843_v62  ;;  %2125 = vmatpush1.bf16.msra.mxu1 %v2845_v63  ;;  %v2848_v62 = vcombine.high %v1209_v57, %v1217_v58  ;;  %v2850_v63 = vcombine.high %v1210_v59, %v1218_v60  ;;  %v1196_v57 = vld [vmem:[#allocation10 + $0x1b8] sm:$0xff]  ;;  %v2821_v60 = vcombine.low %v1180_v48, %v1188_v49 }
 0x37c   :  { %2085 = vmatprep.subr.bf16.mxu0 %v2860_v0  ;;  %2126 = vmatprep.subr.bf16.mxu1 %v2862_v1  ;;  %v1225_v0 = vld [vmem:[#allocation10 + $0x2a0] sm:$0xff]  ;;  %v1204_v58 = vld [vmem:[#allocation10 + $0x1f8] sm:$0xff] }
 0x37d   :  { %v1233_v1 = vld [vmem:[#allocation10 + $0x2e0] sm:$0xff] }
 0x37e   :  { %v2863_v13 = vcombine.low %v1225_v0, %v1233_v1 }
 0x37f   :  { %2086 = vmatpush1.bf16.msra.mxu0 %v2859_v6  ;;  %2127 = vmatpush1.bf16.msra.mxu1 %v2861_v7  ;;  %v2864_v6 = vcombine.high %v1225_v0, %v1233_v1  ;;  %v2866_v7 = vcombine.high %v1226_v2, %v1234_v3  ;;  %v1212_v0 = vld [vmem:[#allocation10 + $0x238] sm:$0xff]  ;;  %v2837_v3 = vcombine.low %v1196_v57, %v1204_v58 }
 0x380   :  { %2087 = vmatprep.subr.bf16.mxu0 %v2876_v8  ;;  %2128 = vmatprep.subr.bf16.mxu1 %v2878_v9  ;;  %v1241_v8 = vld [vmem:[#allocation10 + $0x320] sm:$0xff]  ;;  %v1220_v1 = vld [vmem:[#allocation10 + $0x278] sm:$0xff] }
 0x381   :  { %v1249_v9 = vld [vmem:[#allocation10 + $0x360] sm:$0xff] }
 0x382   :  { %v2879_v22 = vcombine.low %v1241_v8, %v1249_v9 }
 0x383   :  { %2088 = vmatpush1.bf16.msra.mxu0 %v2875_v16  ;;  %2129 = vmatpush1.bf16.msra.mxu1 %v2877_v17  ;;  %v2880_v16 = vcombine.high %v1241_v8, %v1249_v9  ;;  %v2882_v17 = vcombine.high %v1242_v10, %v1250_v11  ;;  %v1236_v8 = vld [vmem:[#allocation10 + $0x2f8] sm:$0xff]  ;;  %v2853_v10 = vcombine.low %v1212_v0, %v1220_v1 }
 0x384   :  { %2089 = vmatprep.subr.bf16.mxu0 %v2892_v18  ;;  %2130 = vmatprep.subr.bf16.mxu1 %v2894_v19  ;;  %v1257_v18 = vld [vmem:[#allocation10 + $0x3a0] sm:$0xff] }
 0x385   :  { %v1265_v19 = vld [vmem:[#allocation10 + $0x3e0] sm:$0xff] }
 0x386   :  { %v2895_v42 = vcombine.low %v1257_v18, %v1265_v19 }
 0x387   :  { %2090 = vmatpush1.bf16.msra.mxu0 %v2891_v25  ;;  %2131 = vmatpush1.bf16.msra.mxu1 %v2893_v26  ;;  %v2896_v25 = vcombine.high %v1257_v18, %v1265_v19  ;;  %v2898_v26 = vcombine.high %v1258_v20, %v1266_v21  ;;  %v1252_v18 = vld [vmem:[#allocation10 + $0x378] sm:$0xff] }
 0x388   :  { %2157 = vmatprep.subr.bf16.mxu0 %v2784_v27  ;;  %2198 = vmatprep.subr.bf16.mxu1 %v2786_v28  ;;  %v1147_v27 = vld [vmem:[#allocation10 + $0x30] sm:$0xff] }
 0x389   :  { %v1155_v28 = vld [vmem:[#allocation10 + $0x70] sm:$0xff] }
 0x38a   :  { %2108 = vmatmul.mubr.bf16.vlgmr.msra.gmra.mrb[16].mxu0 %v3606_v29  ;;  %2149 = vmatmul.mubr.bf16.vlgmr.msra.gmra.mrb[16].mxu1 %v3606_v29  ;;  %v2787_v41 = vcombine.low %v1147_v27, %v1155_v28 }
 0x38b   :  { %2158 = vmatpush1.bf16.msra.mxu0 %v2783_v33  ;;  %2199 = vmatpush1.bf16.msra.mxu1 %v2785_v34  ;;  %v2788_v33 = vcombine.high %v1147_v27, %v1155_v28  ;;  %v2790_v34 = vcombine.high %v1148_v31, %v1156_v50  ;;  %v1268_v27 = vld [vmem:[#allocation10 + $0x3f8] sm:$0xff] }
 0x38c   :  { %2159 = vmatprep.subr.bf16.mxu0 %v2800_v36  ;;  %2200 = vmatprep.subr.bf16.mxu1 %v2802_v37  ;;  %v1163_v36 = vld [vmem:[#allocation10 + $0xb0] sm:$0xff] }
 0x38d   :  { %2189 = vmatprep.mubr.bf16.mxu0 %v3404_v39  ;;  %2230 = vmatprep.mubr.bf16.mxu1 %v3404_v39  ;;  %v1171_v37 = vld [vmem:[#allocation10 + $0xf0] sm:$0xff] }
 0x38e   :  { %v2803_v51 = vcombine.low %v1163_v36, %v1171_v37 }
 0x38f   :  { %2160 = vmatpush1.bf16.msra.mxu0 %v2799_v44  ;;  %2201 = vmatpush1.bf16.msra.mxu1 %v2801_v45  ;;  %v2804_v44 = vcombine.high %v1163_v36, %v1171_v37  ;;  %v2806_v45 = vcombine.high %v1164_v38, %v1172_v40  ;;  %v1269_v36 = vld [vmem:[%s3829_s9] sm:$0xff]  ;;  %v1287_v37 = vsub.s32 3, %v3547_v30 }
 0x390   :  { %2161 = vmatprep.subr.bf16.mxu0 %v2816_v46  ;;  %2202 = vmatprep.subr.bf16.mxu1 %v2818_v47  ;;  %v1179_v46 = vld [vmem:[#allocation10 + $0x130] sm:$0xff]  ;;  %v1276_v38 = vrot.slane %v1269_v36, %v3569_v12 }
 0x391   :  { %v1187_v47 = vld [vmem:[#allocation10 + $0x170] sm:$0xff] }
 0x392   :  { %v2819_v59 = vcombine.low %v1179_v46, %v1187_v47 }
 0x393   :  { %2162 = vmatpush1.bf16.msra.mxu0 %v2815_v53  ;;  %2203 = vmatpush1.bf16.msra.mxu1 %v2817_v54  ;;  %v2820_v53 = vcombine.high %v1179_v46, %v1187_v47  ;;  %v2822_v54 = vcombine.high %v1180_v48, %v1188_v49 }
 0x394   :  { %2163 = vmatprep.subr.bf16.mxu0 %v2832_v55  ;;  %2204 = vmatprep.subr.bf16.mxu1 %v2834_v56  ;;  %v1195_v55 = vld [vmem:[#allocation10 + $0x1b0] sm:$0xff] }
 0x395   :  { %v1203_v56 = vld [vmem:[#allocation10 + $0x1f0] sm:$0xff] }
 0x396   :  { %v2835_v2 = vcombine.low %v1195_v55, %v1203_v56 }
 0x397   :  { %2164 = vmatpush1.bf16.msra.mxu0 %v2831_v24  ;;  %2205 = vmatpush1.bf16.msra.mxu1 %v2833_v61  ;;  %v2836_v24 = vcombine.high %v1195_v55, %v1203_v56  ;;  %v2838_v61 = vcombine.high %v1196_v57, %v1204_v58 }
 0x398   :  { %2165 = vmatprep.subr.bf16.mxu0 %v2848_v62  ;;  %2206 = vmatprep.subr.bf16.mxu1 %v2850_v63  ;;  %v1211_v62 = vld [vmem:[#allocation10 + $0x230] sm:$0xff] }
 0x399   :  { %v1219_v63 = vld [vmem:[#allocation10 + $0x270] sm:$0xff] }
 0x39a   :  { %v2851_v9 = vcombine.low %v1211_v62, %v1219_v63 }
 0x39b   :  { %2166 = vmatpush1.bf16.msra.mxu0 %v2847_v4  ;;  %2207 = vmatpush1.bf16.msra.mxu1 %v2849_v5  ;;  %v2852_v4 = vcombine.high %v1211_v62, %v1219_v63  ;;  %v1227_v5 = vld [vmem:[#allocation10 + $0x2b0] sm:$0xff]  ;;  %v1295_v62 = vsub.s32 5, %v3547_v30  ;;  %v1303_v63 = vsub.s32 7, %v3547_v30 }
 0x39c   :  { %2167 = vmatprep.subr.bf16.mxu0 %v2864_v6  ;;  %2208 = vmatprep.subr.bf16.mxu1 %v2866_v7  ;;  %v1235_v6 = vld [vmem:[#allocation10 + $0x2f0] sm:$0xff]  ;;  %v1228_v7 = vld [vmem:[#allocation10 + $0x2b8] sm:$0xff] }
 0x39d   :  { %v2868_v11 = vcombine.high %v1227_v5, %v1235_v6  ;;  %v2867_v19 = vcombine.low %v1227_v5, %v1235_v6  ;;  %v2869_v20 = vcombine.low %v1228_v7, %v1236_v8 }
 0x39f   :  { %2168 = vmatpush1.bf16.msra.mxu0 %v2863_v13  ;;  %2209 = vmatpush1.bf16.msra.mxu1 %v2865_v15  ;;  %v2870_v13 = vcombine.high %v1228_v7, %v1236_v8  ;;  %v1243_v15 = vld [vmem:[#allocation10 + $0x330] sm:$0xff] }
 0x3a0   :  { %2169 = vmatprep.subr.bf16.mxu0 %v2880_v16  ;;  %2210 = vmatprep.subr.bf16.mxu1 %v2882_v17  ;;  %v1251_v16 = vld [vmem:[#allocation10 + $0x370] sm:$0xff]  ;;  %v1244_v17 = vld [vmem:[#allocation10 + $0x338] sm:$0xff] }
 0x3a1   :  { %v2884_v21 = vcombine.high %v1243_v15, %v1251_v16  ;;  %v2883_v28 = vcombine.low %v1243_v15, %v1251_v16  ;;  %v2885_v31 = vcombine.low %v1244_v17, %v1252_v18 }
 0x3a3   :  { %2170 = vmatpush1.bf16.msra.mxu0 %v2879_v22  ;;  %2211 = vmatpush1.bf16.msra.mxu1 %v2881_v23  ;;  %v2886_v22 = vcombine.high %v1244_v17, %v1252_v18  ;;  %v1259_v23 = vld [vmem:[#allocation10 + $0x3b0] sm:$0xff] }
 0x3a4   :  { %2171 = vmatprep.subr.bf16.mxu0 %v2896_v25  ;;  %2212 = vmatprep.subr.bf16.mxu1 %v2898_v26  ;;  %v1267_v25 = vld [vmem:[#allocation10 + $0x3f0] sm:$0xff]  ;;  %v1260_v26 = vld [vmem:[#allocation10 + $0x3b8] sm:$0xff] }
 0x3a5   :  { %v2900_v50 = vcombine.high %v1259_v23, %v1267_v25 }
 0x3a7   :  { %2172 = vmatpush1.bf16.msra.mxu0 %v2895_v42  ;;  %2213 = vmatpush1.bf16.msra.mxu1 %v2897_v32  ;;  %v2902_v42 = vcombine.high %v1260_v26, %v1268_v27  ;;  %v2899_v32 = vcombine.low %v1259_v23, %v1267_v25 }
 0x3a8   :  { %2239 = vmatprep.subr.bf16.mxu0 %v2788_v33  ;;  %2280 = vmatprep.subr.bf16.mxu1 %v2790_v34  ;;  %v2901_v33 = vcombine.low %v1260_v26, %v1268_v27  ;;  %v1283_v34 = vsub.s32 2, %v3547_v30 }
 0x3aa   :  { %2190 = vmatmul.mubr.bf16.vlgmr.msra.gmra.mrb[20].mxu0 %v3606_v29  ;;  %2231 = vmatmul.mubr.bf16.vlgmr.msra.gmra.mrb[20].mxu1 %v3606_v29  ;;  %v1284_v40 = vrot.slane %v1269_v36, %v1283_v34 }
 0x3ab   :  { %2240 = vmatpush1.bf16.msra.mxu0 %v2787_v41  ;;  %2281 = vmatpush1.bf16.msra.mxu1 %v2789_v43  ;;  %v1280_v41 = vrot.slane %v1269_v36, %v3575_v14  ;;  %v1288_v43 = vrot.slane %v1269_v36, %v1287_v37 }
 0x3ac   :  { %2241 = vmatprep.subr.bf16.mxu0 %v2804_v44  ;;  %2282 = vmatprep.subr.bf16.mxu1 %v2806_v45 }
 0x3ad   :  { %2271 = vmatprep.mubr.bf16.mxu0 %v3404_v39  ;;  %2312 = vmatprep.mubr.bf16.mxu1 %v3404_v39  ;;  %v2854_v39 = vcombine.high %v1212_v0, %v1220_v1 }
 0x3af   :  { %2242 = vmatpush1.bf16.msra.mxu0 %v2803_v51  ;;  %2283 = vmatpush1.bf16.msra.mxu1 %v2805_v52 }
 0x3b0   :  { %2243 = vmatprep.subr.bf16.mxu0 %v2820_v53  ;;  %2284 = vmatprep.subr.bf16.mxu1 %v2822_v54 }
 0x3b3   :  { %2244 = vmatpush1.bf16.msra.mxu0 %v2819_v59  ;;  %2285 = vmatpush1.bf16.msra.mxu1 %v2821_v60 }
 0x3b4   :  { %2245 = vmatprep.subr.bf16.mxu0 %v2836_v24  ;;  %2286 = vmatprep.subr.bf16.mxu1 %v2838_v61  ;;  %v1291_v24 = vsub.s32 4, %v3547_v30  ;;  %v1299_v61 = vsub.s32 6, %v3547_v30 }
 0x3b6   :  { %v1292_v0 = vrot.slane %v1269_v36, %v1291_v24  ;;  %v1300_v1 = vrot.slane %v1269_v36, %v1299_v61 }
 0x3b7   :  { %2246 = vmatpush1.bf16.msra.mxu0 %v2835_v2  ;;  %2287 = vmatpush1.bf16.msra.mxu1 %v2837_v3  ;;  %v1296_v2 = vrot.slane %v1269_v36, %v1295_v62  ;;  %v1304_v3 = vrot.slane %v1269_v36, %v1303_v63 }
 0x3b8   :  { %2247 = vmatprep.subr.bf16.mxu0 %v2852_v4  ;;  %2288 = vmatprep.subr.bf16.mxu1 %v2854_v39 }
 0x3bb   :  { %2248 = vmatpush1.bf16.msra.mxu0 %v2851_v9  ;;  %2289 = vmatpush1.bf16.msra.mxu1 %v2853_v10 }
 0x3bc   :  { %2249 = vmatprep.subr.bf16.mxu0 %v2868_v11  ;;  %2290 = vmatprep.subr.bf16.mxu1 %v2870_v13 }
 0x3bf   :  { %2250 = vmatpush1.bf16.msra.mxu0 %v2867_v19  ;;  %2291 = vmatpush1.bf16.msra.mxu1 %v2869_v20 }
 0x3c0   :  { %2251 = vmatprep.subr.bf16.mxu0 %v2884_v21  ;;  %2292 = vmatprep.subr.bf16.mxu1 %v2886_v22 }
 0x3c3   :  { %2252 = vmatpush1.bf16.msra.mxu0 %v2883_v28  ;;  %2293 = vmatpush1.bf16.msra.mxu1 %v2885_v31 }
 0x3c4   :  { %2253 = vmatprep.subr.bf16.mxu0 %v2900_v50  ;;  %2294 = vmatprep.subr.bf16.mxu1 %v2902_v42 }
 0x3c7   :  { %2254 = vmatpush1.bf16.msra.mxu0 %v2899_v32  ;;  %2295 = vmatpush1.bf16.msra.mxu1 %v2901_v33 }
 0x3ca   :  { %2272 = vmatmul.mubr.bf16.vlgmr.msra.gmra.mrb[24].mxu0 %v3606_v29  ;;  %2313 = vmatmul.mubr.bf16.vlgmr.msra.gmra.mrb[24].mxu1 %v3606_v29 }
 0x43d   :  { %v2027_v44 = vpop.f32.mrb[12].mxu0  ;;  %v2068_v29 = vpop.f32.mrb[12].mxu1 }
 0x43e   :  { %v2028_v45 = vadd.f32 %v2027_v44, %v1276_v38  ;;  %v2069_v46 = vadd.f32 %v2068_v29, %v1284_v40  ;;  %v2029_v47 = vpop.f32.mrb[13].mxu0  ;;  %v2070_v48 = vpop.f32.mrb[13].mxu1 }
 0x43f   :  { %v2030_v49 = vadd.f32 %v2029_v47, %v1280_v41  ;;  %v2071_v51 = vadd.f32 %v2070_v48, %v1288_v43  ;;  %v2031_v52 = vpop.f32.mrb[14].mxu0  ;;  %v2072_v53 = vpop.f32.mrb[14].mxu1 }
 0x440   :  { %v2032_v54 = vpop.f32.mrb[15].mxu0  ;;  %v2073_v55 = vpop.f32.mrb[15].mxu1 }
 0x441   :  { %v2903_v56 = vpack.c.bf16 %v2030_v49, %v2028_v45  ;;  %v2904_v57 = vpack.c.bf16 %v2071_v51, %v2069_v46 }
 0x443   :  { %v2347_v58 = vrot.slane %v2903_v56, %v3550_v35  ;;  %v2354_v59 = vrot.slane %v2904_v57, %v3550_v35 }
 0x445   :  { %v2369_v60 = vcombine.low %v2347_v58, %v2354_v59 }
 0x45d   :  { %v2109_v4 = vpop.f32.mrb[16].mxu0  ;;  %v2150_v39 = vpop.f32.mrb[16].mxu1 }
 0x45e   :  { %v2110_v5 = vadd.f32 %v2109_v4, %v1292_v0  ;;  %v2151_v6 = vadd.f32 %v2150_v39, %v1300_v1  ;;  %v2111_v7 = vpop.f32.mrb[17].mxu0  ;;  %v2152_v8 = vpop.f32.mrb[17].mxu1 }
 0x45f   :  { %v2112_v9 = vadd.f32 %v2111_v7, %v1296_v2  ;;  %v2153_v10 = vadd.f32 %v2152_v8, %v1304_v3  ;;  %v2113_v11 = vpop.f32.mrb[18].mxu0  ;;  %v2154_v13 = vpop.f32.mrb[18].mxu1 }
 0x460   :  { %3304 = shalt.err (!%p3301_p2)
}
 0x461   :  { %s3305_s30 = scalar_lea.hbm %s3833_s13, 32 }
 0x462   :  { %p3306_p3 = scmp.ne.s32.totalorder %s3833_s13, %s3305_s30  ;;  %p3309_p4 = scmp.lt.u32.totalorder %s3305_s30, %s3833_s13 }
 0x464   :  { %p3311_p5 = pnand %p3309_p4, %p3306_p3 }
 0x466   :  { %3314 = shalt.err (!%p3311_p5)
}
 0x467   :  { %2666 = dma.vmem_to_hbm [thread:$0]  %s2664_s24, 32, %s3833_s13, [#allocation16]   ;;  %v2114_v15 = vpop.f32.mrb[19].mxu0  ;;  %v2155_v16 = vpop.f32.mrb[19].mxu1  ;;  %v2905_v17 = vpack.c.bf16 %v2112_v9, %v2110_v5  ;;  %v2906_v18 = vpack.c.bf16 %v2153_v10, %v2151_v6  ;;  %v2377_v22 = vrot.slane %v2369_v60, %v3550_v35 }
 0x468   :  { %s3408_s26 = smov [#allocation11]  }
 0x469   :  { %v2361_v19 = vrot.slane %v2905_v17, %v3550_v35  ;;  %v2368_v20 = vrot.slane %v2906_v18, %v3550_v35  ;;  %s2633_s4 = sshll.u32 %s3408_s26, 4  ;;  %s2634_s4 = int_to_ptr.vmem [resolvable:$true] %s2633_s4 }
 0x46a   :  { %s3315_s14 = scalar_lea.vmem %s2634_s4, 128  ;;  %p3320_p7 = scmp.lt.s32.totalorder %s2634_s4, %s2634_s4 }
 0x46b   :  { %v2370_v21 = vcombine.low %v2361_v19, %v2368_v20  ;;  %p3316_p6 = scmp.ne.s32.totalorder %s2634_s4, %s3315_s14  ;;  %p3321_p8 = scmp.lt.s32.totalorder %s3315_s14, %s3315_s14 }
 0x46d   :  { %v2384_v23 = vrot.slane %v2370_v21, %v3550_v35  ;;  %p3322_p9 = por %p3321_p8, %p3320_p7 }
 0x46f   :  { %v2385_v25 = vcombine.low %v2377_v22, %v2384_v23  ;;  %p3323_p10 = pnand %p3322_p9, %p3316_p6 }
 0x471   :  { %2387 = vst [vmem:[#allocation11] sm:$0xff] %v2385_v25 }
 0x472   :  { %3326 = shalt.err (!%p3323_p10)
}
 0x473   :  { %s3327_s8 = scalar_lea.hbm %s3830_s10, 128 }
 0x474   :  { %p3328_p11 = scmp.ne.s32.totalorder %s3830_s10, %s3327_s8  ;;  %p3331_p12 = scmp.lt.u32.totalorder %s3327_s8, %s3830_s10 }
 0x476   :  { %p3333_p13 = pnand %p3331_p12, %p3328_p11 }
 0x478   :  { %3336 = shalt.err (!%p3333_p13)
}
 0x479   :  { %2636 = dma.vmem_to_hbm [thread:$0]  %s2634_s4, 128, %s3830_s10, [#allocation4]   ;;  %v1270_v26 = vld [vmem:[%s3829_s9 + $0x8] sm:$0xff] }
 0x47a   :  { %v1308_v27 = vrot.slane %v1270_v26, %v3569_v12  ;;  %v1316_v28 = vrot.slane %v1270_v26, %v1283_v34  ;;  %v1312_v31 = vrot.slane %v1270_v26, %v3575_v14  ;;  %v1320_v50 = vrot.slane %v1270_v26, %v1287_v37  ;;  %s3409_s9 = smov [#allocation12]   ;;  %s3410_s0 = smov [#allocation14]  }
 0x47b   :  { %v1324_v5 = vrot.slane %v1270_v26, %v1291_v24  ;;  %v1332_v8 = vrot.slane %v1270_v26, %v1299_v61  ;;  %v1328_v9 = vrot.slane %v1270_v26, %v1295_v62  ;;  %v1336_v15 = vrot.slane %v1270_v26, %v1303_v63  ;;  %s2643_s10 = sshll.u32 %s3409_s9, 4  ;;  %s2653_s25 = sshll.u32 %s3410_s0, 4  ;;  %s2644_s10 = int_to_ptr.vmem [resolvable:$true] %s2643_s10  ;;  %s2654_s25 = int_to_ptr.vmem [resolvable:$true] %s2653_s25 }
 0x47c   :  { %s3337_s24 = scalar_lea.vmem %s2644_s10, 128  ;;  %p3342_p1 = scmp.lt.s32.totalorder %s2644_s10, %s2644_s10 }
 0x47d   :  { %v2191_v42 = vpop.f32.mrb[20].mxu0  ;;  %v2232_v32 = vpop.f32.mrb[20].mxu1  ;;  %p3338_p0 = scmp.ne.s32.totalorder %s2644_s10, %s3337_s24  ;;  %p3343_p2 = scmp.lt.s32.totalorder %s3337_s24, %s3337_s24 }
 0x47e   :  { %v3684_v33 = vadd.f32 %v2191_v42, %v1308_v27  ;;  %v3686_v36 = vadd.f32 %v2232_v32, %v1316_v28  ;;  %v2193_v38 = vpop.f32.mrb[21].mxu0  ;;  %v2234_v40 = vpop.f32.mrb[21].mxu1 }
 0x47f   :  { %v3688_v41 = vadd.f32 %v2193_v38, %v1312_v31  ;;  %v3690_v43 = vadd.f32 %v2234_v40, %v1320_v50  ;;  %v2195_v12 = vpop.f32.mrb[22].mxu0  ;;  %v2236_v44 = vpop.f32.mrb[22].mxu1  ;;  %p3344_p3 = por %p3343_p2, %p3342_p1 }
 0x480   :  { %v2412_v34 = vand.u32 2147483647, %v3684_v33  ;;  %v2196_v14 = vpop.f32.mrb[23].mxu0  ;;  %v2237_v29 = vpop.f32.mrb[23].mxu1  ;;  %v2414_v37 = vand.u32 2147483647, %v3686_v36  ;;  %vm2396_vm8 = vcmp.ne.f32.partialorder %v3684_v33, %v3684_v33  ;;  %vm2398_vm9 = vcmp.ne.f32.partialorder %v3686_v36, %v3686_v36 }
 0x481   :  { %v2413_v46 = vand.u32 2147483647, %v3688_v41  ;;  %v2415_v48 = vand.u32 2147483647, %v3690_v43  ;;  %v2388_v10 = vmax.f32 %v3684_v33, 0.0  ;;  %v2390_v24 = vmax.f32 %v3686_v36, 0.0  ;;  %p3345_p4 = pnand %p3344_p3, %p3338_p0 }
 0x482   :  { %v2420_v45 = vsub.f32 0.0, %v2412_v34  ;;  %v2422_v47 = vsub.f32 0.0, %v2414_v37  ;;  %v2389_v61 = vmax.f32 %v3688_v41, 0.0  ;;  %vm2397_vm11 = vcmp.ne.f32.partialorder %v3688_v41, %v3688_v41 }
 0x483   :  { %v2421_v51 = vsub.f32 0.0, %v2413_v46  ;;  %v2423_v53 = vsub.f32 0.0, %v2415_v48  ;;  %v2391_v30 = vmax.f32 %v3690_v43, 0.0  ;;  %vm2399_vm15 = vcmp.ne.f32.partialorder %v3690_v43, %v3690_v43 }
 0x484   :  { %v2428_v49 = vmul.f32 1.442695, %v2420_v45  ;;  %v2432_v52 = vmul.f32 1.442695, %v2422_v47 }
 0x485   :  { %v2430_v54 = vmul.f32 1.442695, %v2421_v51  ;;  %v2434_v55 = vmul.f32 1.442695, %v2423_v53 }
 0x486   :  { %3151 = vpow2.f32 %v2428_v49 }
 0x487   :  { %3153 = vpow2.f32 %v2432_v52 }
 0x488   :  { %3155 = vpow2.f32 %v2430_v54 }
 0x489   :  { %3157 = vpow2.f32 %v2434_v55 }
 0x490   :  { %v3152_v56 = vpop.eup %3151 }
 0x491   :  { %v3154_v57 = vpop.eup %3153  ;;  %v2444_v58 = vadd.f32 1.0, %v3152_v56  ;;  %v2447_v3 = vmul.f32 -0.5, %v3152_v56  ;;  %v2450_v6 = vand.u32 2147483647, %v3152_v56 }
 0x492   :  { %v3156_v59 = vpop.eup %3155  ;;  %v2462_v60 = vadd.f32 1.0, %v3154_v57  ;;  %v2465_v4 = vmul.f32 -0.5, %v3154_v57  ;;  %v2468_v13 = vand.u32 2147483647, %v3154_v57 }
 0x493   :  { %v3158_v0 = vpop.eup %3157  ;;  %3159 = vlog2.f32 %v2444_v58  ;;  %v2453_v1 = vadd.f32 1.0, %v3156_v59  ;;  %v2456_v39 = vmul.f32 -0.5, %v3156_v59  ;;  %v2448_v11 = vadd.f32 1.0, %v2447_v3 }
 0x494   :  { %3161 = vlog2.f32 %v2462_v60  ;;  %v2471_v2 = vadd.f32 1.0, %v3158_v0  ;;  %v2474_v7 = vmul.f32 -0.5, %v3158_v0  ;;  %v2466_v16 = vadd.f32 1.0, %v2465_v4 }
 0x495   :  { %3163 = vlog2.f32 %v2453_v1  ;;  %v2459_v17 = vand.u32 2147483647, %v3156_v59  ;;  %v2457_v62 = vadd.f32 1.0, %v2456_v39  ;;  %v2477_v18 = vand.u32 2147483647, %v3158_v0 }
 0x496   :  { %3165 = vlog2.f32 %v2471_v2  ;;  %vm3711_vm10 = vcmp.lt.f32.partialorder %v2450_v6, 0.0004427343  ;;  %v2475_v63 = vadd.f32 1.0, %v2474_v7  ;;  %v2449_v26 = vmul.f32 %v3152_v56, %v2448_v11 }
 0x497   :  { %vm3718_vm12 = vcmp.lt.f32.partialorder %v2468_v13, 0.0004427343  ;;  %v2467_v38 = vmul.f32 %v3154_v57, %v2466_v16  ;;  %vm3724_vm13 = vcmp.lt.f32.partialorder %v2459_v17, 0.0004427343  ;;  %v2458_v37 = vmul.f32 %v3156_v59, %v2457_v62 }
 0x498   :  { %vm3732_vm14 = vcmp.lt.f32.partialorder %v2477_v18, 0.0004427343  ;;  %v2476_v52 = vmul.f32 %v3158_v0, %v2475_v63 }
 0x49d   :  { %v3160_v19 = vpop.eup %3159  ;;  %v2273_v21 = vpop.f32.mrb[24].mxu0 }
 0x49e   :  { %v2314_v22 = vpop.f32.mrb[24].mxu1  ;;  %v3162_v23 = vpop.eup %3161  ;;  %v2446_v25 = vmul.f32 0.6931472, %v3160_v19  ;;  %v3722_v28 = vadd.f32 %v2273_v21, %v1324_v5 }
 0x49f   :  { %v2275_v31 = vpop.f32.mrb[25].mxu0  ;;  %v2316_v50 = vpop.f32.mrb[25].mxu1  ;;  %v2464_v32 = vmul.f32 0.6931472, %v3162_v23  ;;  %v3728_v12 = vadd.f32 %v2314_v22, %v1332_v8 }
 0x4a0   :  { %v3164_v42 = vpop.eup %3163  ;;  %v2277_v44 = vpop.f32.mrb[26].mxu0  ;;  %v2452_v14 = vsel %vm3711_vm10, %v2449_v26, %v2446_v25  ;;  %v2416_v53 = vand.u32 2147483647, %v3722_v28  ;;  %v3741_v57 = vadd.f32 %v2275_v31, %v1328_v9  ;;  %v3754_v4 = vadd.f32 %v2316_v50, %v1336_v15 }
 0x4a1   :  { %v2318_v34 = vpop.f32.mrb[26].mxu1  ;;  %v2455_v29 = vmul.f32 0.6931472, %v3164_v42  ;;  %v2278_v46 = vpop.f32.mrb[27].mxu0  ;;  %v2516_v49 = vadd.f32 %v2452_v14, %v2388_v10  ;;  %v2470_v51 = vsel %vm3718_vm12, %v2467_v38, %v2464_v32  ;;  %v2418_v1 = vand.u32 2147483647, %v3728_v12 }
 0x4a2   :  { %v2319_v47 = vpop.f32.mrb[27].mxu1  ;;  %v3166_v48 = vpop.eup %3165  ;;  %v2518_v54 = vadd.f32 %v2470_v51, %v2390_v24  ;;  %v2424_v60 = vsub.f32 0.0, %v2416_v53  ;;  %v2419_v24 = vand.u32 2147483647, %v3754_v4  ;;  %vm2400_vm1 = vcmp.ne.f32.partialorder %v3722_v28, %v3722_v28 }
 0x4a3   :  { %v2461_v55 = vsel %vm3724_vm13, %v2458_v37, %v2455_v29  ;;  %v2473_v56 = vmul.f32 0.6931472, %v3166_v48  ;;  %v2524_v58 = vsel %vm2396_vm8, %v3684_v33, %v2516_v49  ;;  %v2426_v8 = vsub.f32 0.0, %v2418_v1 }
 0x4a4   :  { %v2517_v59 = vadd.f32 %v2461_v55, %v2389_v61  ;;  %v2532_v2 = vadd.f32 1e-06, %v2524_v58  ;;  %v2526_v0 = vsel %vm2398_vm9, %v3686_v36, %v2518_v54  ;;  %v2436_v6 = vmul.f32 1.442695, %v2424_v60 }
 0x4a5   :  { %v2479_v3 = vsel %vm3732_vm14, %v2476_v52, %v2473_v56  ;;  %v2534_v39 = vadd.f32 1e-06, %v2526_v0  ;;  %v2417_v36 = vand.u32 2147483647, %v3741_v57  ;;  %v2440_v13 = vmul.f32 1.442695, %v2426_v8 }
 0x4a6   :  { %v2525_v33 = vsel %vm2397_vm11, %v3688_v41, %v2517_v59  ;;  %v2519_v5 = vadd.f32 %v2479_v3, %v2391_v30  ;;  %3167 = vpow2.f32 %v2436_v6  ;;  %v2427_v61 = vsub.f32 0.0, %v2419_v24 }
 0x4a7   :  { %v2533_v7 = vadd.f32 1e-06, %v2525_v33  ;;  %v2425_v15 = vsub.f32 0.0, %v2417_v36  ;;  %3169 = vpow2.f32 %v2440_v13  ;;  %v2392_v29 = vmax.f32 %v3722_v28, 0.0 }
 0x4a8   :  { %v2527_v9 = vsel %vm2399_vm15, %v3690_v43, %v2519_v5  ;;  %v2442_v18 = vmul.f32 1.442695, %v2427_v61  ;;  %v2394_v53 = vmax.f32 %v3728_v12, 0.0  ;;  %vm2402_vm4 = vcmp.ne.f32.partialorder %v3728_v12, %v3728_v12 }
 0x4a9   :  { %v2907_v10 = vpack.c.bf16 %v2533_v7, %v2532_v2  ;;  %v2535_v11 = vadd.f32 1e-06, %v2527_v9  ;;  %v2438_v41 = vmul.f32 1.442695, %v2425_v15  ;;  %v2393_v2 = vmax.f32 %v3741_v57, 0.0 }
 0x4aa   :  { %vm2401_vm5 = vcmp.ne.f32.partialorder %v3741_v57, %v3741_v57  ;;  %vm2403_vm7 = vcmp.ne.f32.partialorder %v3754_v4, %v3754_v4 }
 0x4ab   :  { %v2908_v16 = vpack.c.bf16 %v2535_v11, %v2534_v39  ;;  %v3766_v17 = vrot.slane %v2907_v10, %v3550_v35  ;;  %3171 = vpow2.f32 %v2438_v41 }
 0x4ac   :  { %3173 = vpow2.f32 %v2442_v18 }
 0x4ad   :  { %v3769_v62 = vrot.slane %v2908_v16, %v3550_v35 }
 0x4af   :  { %v2588_v43 = vcombine.low %v3766_v17, %v3769_v62 }
 0x4b0   :  { %v3168_v19 = vpop.eup %3167 }
 0x4b1   :  { %v2480_v20 = vadd.f32 1.0, %v3168_v19  ;;  %v3170_v30 = vpop.eup %3169  ;;  %v2483_v22 = vmul.f32 -0.5, %v3168_v19  ;;  %v2486_v50 = vand.u32 2147483647, %v3168_v19 }
 0x4b2   :  { %v2498_v63 = vadd.f32 1.0, %v3170_v30  ;;  %v2501_v26 = vmul.f32 -0.5, %v3170_v30  ;;  %v2504_v34 = vand.u32 2147483647, %v3170_v30 }
 0x4b3   :  { %3175 = vlog2.f32 %v2480_v20  ;;  %v2484_v31 = vadd.f32 1.0, %v2483_v22  ;;  %vm2487_vm0 = vcmp.lt.f32.partialorder %v2486_v50, 0.0004427343 }
 0x4b4   :  { %3177 = vlog2.f32 %v2498_v63  ;;  %v2502_v38 = vadd.f32 1.0, %v2501_v26  ;;  %vm2505_vm2 = vcmp.lt.f32.partialorder %v2504_v34, 0.0004427343 }
 0x4b5   :  { %v3172_v21 = vpop.eup %3171  ;;  %v2485_v44 = vmul.f32 %v3168_v19, %v2484_v31 }
 0x4b6   :  { %v2489_v23 = vadd.f32 1.0, %v3172_v21  ;;  %v3174_v25 = vpop.eup %3173  ;;  %v2492_v42 = vmul.f32 -0.5, %v3172_v21  ;;  %v2495_v47 = vand.u32 2147483647, %v3172_v21  ;;  %v2503_v51 = vmul.f32 %v3170_v30, %v2502_v38 }
 0x4b7   :  { %v2507_v27 = vadd.f32 1.0, %v3174_v25  ;;  %v2510_v14 = vmul.f32 -0.5, %v3174_v25  ;;  %v2513_v59 = vand.u32 2147483647, %v3174_v25 }
 0x4b8   :  { %3179 = vlog2.f32 %v2489_v23  ;;  %v2493_v37 = vadd.f32 1.0, %v2492_v42  ;;  %vm2496_vm3 = vcmp.lt.f32.partialorder %v2495_v47, 0.0004427343 }
 0x4b9   :  { %3181 = vlog2.f32 %v2507_v27  ;;  %v2511_v54 = vadd.f32 1.0, %v2510_v14  ;;  %vm2514_vm6 = vcmp.lt.f32.partialorder %v2513_v59, 0.0004427343 }
 0x4ba   :  { %v2494_v58 = vmul.f32 %v3172_v21, %v2493_v37 }
 0x4bb   :  { %v2512_v5 = vmul.f32 %v3174_v25, %v2511_v54 }
 0x4bd   :  { %v3176_v32 = vpop.eup %3175 }
 0x4be   :  { %v2482_v40 = vmul.f32 0.6931472, %v3176_v32  ;;  %v3178_v45 = vpop.eup %3177 }
 0x4bf   :  { %v2500_v49 = vmul.f32 0.6931472, %v3178_v45 }
 0x4c0   :  { %v2488_v46 = vsel %vm2487_vm0, %v2485_v44, %v2482_v40 }
 0x4c1   :  { %v2520_v48 = vadd.f32 %v2488_v46, %v2392_v29  ;;  %v2506_v55 = vsel %vm2505_vm2, %v2503_v51, %v2500_v49 }
 0x4c2   :  { %v3180_v52 = vpop.eup %3179  ;;  %v2522_v1 = vadd.f32 %v2506_v55, %v2394_v53 }
 0x4c3   :  { %v2491_v56 = vmul.f32 0.6931472, %v3180_v52  ;;  %v2528_v60 = vsel %vm2400_vm1, %v3722_v28, %v2520_v48  ;;  %v3182_v0 = vpop.eup %3181  ;;  %v2395_v28 = vmax.f32 %v3754_v4, 0.0 }
 0x4c4   :  { %v2509_v33 = vmul.f32 0.6931472, %v3182_v0  ;;  %v2536_v6 = vadd.f32 1e-06, %v2528_v60  ;;  %v2530_v7 = vsel %vm2402_vm4, %v3728_v12, %v2522_v1 }
 0x4c5   :  { %v2497_v3 = vsel %vm2496_vm3, %v2494_v58, %v2491_v56  ;;  %v2538_v11 = vadd.f32 1e-06, %v2530_v7 }
 0x4c6   :  { %v2521_v39 = vadd.f32 %v2497_v3, %v2393_v2  ;;  %v2515_v36 = vsel %vm2514_vm6, %v2512_v5, %v2509_v33 }
 0x4c7   :  { %v2523_v10 = vadd.f32 %v2515_v36, %v2395_v28 }
 0x4c8   :  { %v2529_v8 = vsel %vm2401_vm5, %v3741_v57, %v2521_v39  ;;  %v2596_v57 = vrot.slane %v2588_v43, %v3550_v35 }
 0x4c9   :  { %v2537_v9 = vadd.f32 1e-06, %v2529_v8  ;;  %v2531_v15 = vsel %vm2403_vm7, %v3754_v4, %v2523_v10 }
 0x4ca   :  { %v2539_v24 = vadd.f32 1e-06, %v2531_v15 }
 0x4cb   :  { %v2909_v13 = vpack.c.bf16 %v2537_v9, %v2536_v6 }
 0x4cc   :  { %v2910_v16 = vpack.c.bf16 %v2539_v24, %v2538_v11 }
 0x4cd   :  { %v2580_v41 = vrot.slane %v2909_v13, %v3550_v35 }
 0x4ce   :  { %v2587_v12 = vrot.slane %v2910_v16, %v3550_v35 }
 0x4d0   :  { %v2589_v61 = vcombine.low %v2580_v41, %v2587_v12 }
 0x4d2   :  { %v2603_v18 = vrot.slane %v2589_v61, %v3550_v35 }
 0x4d4   :  { %v2604_v19 = vcombine.low %v2596_v57, %v2603_v18 }
 0x4d6   :  { %2606 = vst [vmem:[#allocation12] sm:$0xff] %v2604_v19 }
 0x4d7   :  { %3348 = shalt.err (!%p3345_p4)
}
 0x4d8   :  { %s3349_s29 = scalar_lea.hbm %s3831_s11, 128 }
 0x4d9   :  { %p3350_p5 = scmp.ne.s32.totalorder %s3831_s11, %s3349_s29  ;;  %p3353_p6 = scmp.lt.u32.totalorder %s3349_s29, %s3831_s11 }
 0x4db   :  { %p3355_p7 = pnand %p3353_p6, %p3350_p5 }
 0x4dd   :  { %3358 = shalt.err (!%p3355_p7)
}
 0x4de   :  { %2646 = dma.vmem_to_hbm [thread:$0]  %s2644_s10, 128, %s3831_s11, [#allocation13]  }
 0x4df   :  { %s3359_s2 = scalar_lea.vmem %s2654_s25, 32  ;;  %p3364_p9 = scmp.lt.s32.totalorder %s2654_s25, %s2654_s25 }
 0x4e0   :  { %p3360_p8 = scmp.ne.s32.totalorder %s2654_s25, %s3359_s2  ;;  %p3365_p10 = scmp.lt.s32.totalorder %s3359_s2, %s3359_s2 }
 0x4e2   :  { %p3366_p11 = por %p3365_p10, %p3364_p9 }
 0x4e4   :  { %p3367_p12 = pnand %p3366_p11, %p3360_p8 }
 0x4e6   :  { %3370 = shalt.err (!%p3367_p12)
}
 0x4e7   :  { %s3371_s14 = scalar_lea.hbm %s3832_s12, 32 }
 0x4e8   :  { %p3372_p13 = scmp.ne.s32.totalorder %s3832_s12, %s3371_s14  ;;  %p3375_p0 = scmp.lt.u32.totalorder %s3371_s14, %s3832_s12 }
 0x4ea   :  { %p3377_p1 = pnand %p3375_p0, %p3372_p13 }
 0x4ec   :  { %3380 = shalt.err (!%p3377_p1)
}
 0x4ed   :  { %2656 = dma.vmem_to_hbm [thread:$0]  %s2654_s25, 32, %s3832_s12, [#allocation13]  }
 0x4ee   :  { %3387 = dma.done.wait [#allocation4], 128  }
 0x4ef   :  { %3388 = vsyncadd [#allocation4], 4294967168 }
 0x4f0   :  { %3389 = dma.done.wait [#allocation13], 160  }
 0x4f1   :  { %3390 = vsyncadd [#allocation13], 4294967136 }
 0x4f2   :  { %3391 = dma.done.wait [#allocation16], 32  }
 0x4f3   :  { %3392 = vsyncadd [#allocation16], 4294967264 }
 0x4f4   :  { %2679 = vsyncpa [#allocation3], 1 }
 0x4f5   :  { %2680 = vsyncpa [#allocation6], 1 }
 0x4f6   :  { %2681 = vsyncpa [#allocation9], 1 }
 0x4f7   :  { %2682 = vsyncpa [#allocation4], 1 }
 0x4f8   :  { %2683 = vsyncpa [#allocation13], 1 }
 0x4f9   :  { %2684 = vsyncpa [#allocation16], 1 }

</bundles_post_ra>
